<compile_context>
chip_gen: v5e
topology: v5e:2x2
jax: 0.10.0
libtpu: 0.0.40
codegen_flags: <defaults>
</compile_context>

<pallas_src>
import functools

import jax
import jax.numpy as jnp
import numpy as np
from jax import lax
from jax.experimental import pallas as pl
from jax.experimental.pallas import tpu as pltpu

NEG = -1e30  # large-magnitude stand-in for -inf (torch max_pool2d pads with -inf)


def _comb_sums_kernel(pred_ref, tgt_ref, out_ref, buf_ref, *,
                      H, W, theta0, theta, pmax):
    """Per-(n, channel-block) kernel: boundary maps + all per-channel reductions.

    pred_ref/tgt_ref: (Cblk, H, W) raw (unpadded) image blocks.
    out_ref:          (7, Cblk) -> rows = [inter, sum_p, sum_t, sum(pb*gbe), sum(pb),
                                           sum(pbe*gb), sum(gb)] per channel.
    buf_ref:          (Cblk, H + 2*pmax, W + 2*pmax) shared VMEM scratch (NEG frame).
    """
    x = pred_ref[...].astype(jnp.float32)
    t = tgt_ref[...].astype(jnp.float32)

    # Reset the -inf frame once per step; only the interior is ever overwritten below,
    # so the frame stays NEG across all four pool invocations of this step.
    buf_ref[...] = jnp.full(buf_ref.shape, NEG, jnp.float32)

    def framed_pool(img, k):
        # stride-1 'same' max-pool with implicit -inf padding (== F.max_pool2d),
        # evaluated separably: 1xk lane max then kx1 sublane max.
        p = (k - 1) // 2
        buf_ref[:, pmax:pmax + H, pmax:pmax + W] = img
        r0 = pmax - p
        c0 = pmax - p
        He = H + 2 * p
        # horizontal (lane) pass on the row-extended region
        hmax = buf_ref[:, r0:r0 + He, c0:c0 + W]
        for d in range(1, k):
            hmax = jnp.maximum(hmax, buf_ref[:, r0:r0 + He, c0 + d:c0 + d + W])
        # vertical (sublane) pass
        out = hmax[:, 0:H, :]
        for d in range(1, k):
            out = jnp.maximum(out, hmax[:, d:d + H, :])
        return out

    u_p = 1.0 - x
    u_t = 1.0 - t
    # Sequential reuse of the single framed buffer: each framed_pool call stores the
    # interior before reading, and all previous pool results are already materialized
    # values, so there is no aliasing hazard.
    pred_b = framed_pool(u_p, theta0) - u_p          # (Cblk, H, W)
    gt_b = framed_pool(u_t, theta0) - u_t
    pred_b_ext = framed_pool(pred_b, theta)
    gt_b_ext = framed_pool(gt_b, theta)

    def csum(a):  # (Cblk, H, W) -> (Cblk,)  (two minor-axis XLU reductions)
        return jnp.sum(jnp.sum(a, axis=2), axis=1)

    sums = [csum(x * t),               # dice intersection
            csum(x),                   # dice A_sum
            csum(t),                   # dice B_sum
            csum(pred_b * gt_b_ext),   # boundary P numerator
            csum(pred_b),              # boundary P denominator
            csum(pred_b_ext * gt_b),   # boundary R numerator
            csum(gt_b)]                # boundary R denominator
    for i, s in enumerate(sums):
        out_ref[i:i + 1, :] = s.reshape(1, -1)


def _pick_cblk(N, C, H, W, budget_bytes=2 << 20):
    """Largest channel block whose f32 plane stack fits the per-buffer budget."""
    divisors = [d for d in range(1, C + 1) if C % d == 0]
    fits = [d for d in divisors if d * H * W * 4 <= budget_bytes]
    if not fits:
        # TODO(synk): add spatial (H) halo tiling for planes too large for one block.
        fits = [1]
    cblk = max(fits)
    # Keep >= 2 grid steps when possible so v7x's two TensorCores both get work.
    if N * (C // cblk) < 2:
        smaller = [d for d in fits if C // d >= 2]
        if smaller:
            cblk = max(smaller)
    return cblk


def comb_loss_pallas(predict, targets, *, alpha=0.6, smooth=1.0, theta0=3, theta=5):
    assert predict.shape == targets.shape
    N, C, H, W = predict.shape
    p0 = (theta0 - 1) // 2
    p1 = (theta - 1) // 2
    pmax = max(p0, p1)

    cblk = _pick_cblk(N, C, H, W)
    cb = C // cblk

    predict = predict.astype(jnp.float32)
    targets = targets.astype(jnp.float32)

    kernel = functools.partial(_comb_sums_kernel, H=H, W=W,
                               theta0=theta0, theta=theta, pmax=pmax)
    img_spec = pl.BlockSpec((pl.Squeezed(), cblk, H, W), lambda n, c: (n, c, 0, 0))

    sums = pl.pallas_call(
        kernel,
        out_shape=jax.ShapeDtypeStruct((N, cb, 7, cblk), jnp.float32),
        grid_spec=pltpu.PrefetchScalarGridSpec(
            num_scalar_prefetch=0,
            grid=(N, cb),
            in_specs=[img_spec, img_spec],
            out_specs=pl.BlockSpec((pl.Squeezed(), pl.Squeezed(), 7, cblk),
                                   lambda n, c: (n, c, 0, 0)),
            scratch_shapes=[
                pltpu.VMEM((cblk, H + 2 * pmax, W + 2 * pmax), jnp.float32),
            ],
        ),
        compiler_params=pltpu.CompilerParams(
            dimension_semantics=("parallel", "parallel"),
            vmem_limit_bytes=48 * 1024 * 1024,
        ),
    )(predict, targets)

    # (N, cb, 7, cblk) -> (N, C, 7)
    sums = jnp.transpose(sums, (0, 1, 3, 2)).reshape(N, C, 7)
    s0, s1, s2, s3, s4, s5, s6 = (sums[..., i] for i in range(7))

    # BinaryDiceLoss (flatten over C*H*W per batch, reduction='mean', smooth=1).
    inter = s0.sum(axis=1)
    a_sum = s1.sum(axis=1)
    b_sum = s2.sum(axis=1)
    dice = jnp.mean(1.0 - (2.0 * inter + smooth) / (a_sum + b_sum + smooth))

    # BoundaryLoss.
    P = s3 / (s4 + 1e-7)
    R = s5 / (s6 + 1e-7)
    BF1 = 2.0 * P * R / (P + R + 1e-7)
    boundary = jnp.mean(1.0 - BF1)

    return boundary * alpha + (1.0 - alpha) * dice


def comb_loss_reference(predict, targets, *, alpha=0.6, smooth=1.0, theta0=3, theta=5):
    """Pure-JAX reference matching the PyTorch module."""
    N, C, H, W = predict.shape

    def maxpool(x, k):
        p = (k - 1) // 2
        return lax.reduce_window(x, -jnp.inf, lax.max,
                                 (1, 1, k, k), (1, 1, 1, 1),
                                 padding=((0, 0), (0, 0), (p, p), (p, p)))

    pf = predict.reshape(N, -1)
    tf = targets.reshape(N, -1)
    inter = (pf * tf).sum(1)
    dice = jnp.mean(1.0 - (2.0 * inter + smooth) / (pf.sum(1) + tf.sum(1) + smooth))

    gt_b = maxpool(1.0 - targets, theta0) - (1.0 - targets)
    pred_b = maxpool(1.0 - predict, theta0) - (1.0 - predict)
    gt_b_ext = maxpool(gt_b, theta)
    pred_b_ext = maxpool(pred_b, theta)
    P = (pred_b * gt_b_ext).sum((2, 3)) / (pred_b.sum((2, 3)) + 1e-7)
    R = (pred_b_ext * gt_b).sum((2, 3)) / (gt_b.sum((2, 3)) + 1e-7)
    BF1 = 2.0 * P * R / (P + R + 1e-7)
    boundary = jnp.mean(1.0 - BF1)
    return boundary * alpha + (1.0 - alpha) * dice


if __name__ == "__main__":
    key = jax.random.PRNGKey(0)
    k1, k2 = jax.random.split(key)
    N, C, H, W = 2, 4, 16, 16
    predict = jax.random.uniform(k1, (N, C, H, W), dtype=jnp.float32)
    targets = (jax.random.uniform(k2, (N, C, H, W)) > 0.5).astype(jnp.float32)

    loss = jax.block_until_ready(comb_loss_pallas(predict, targets))
    ref = jax.block_until_ready(comb_loss_reference(predict, targets))

    np.testing.assert_allclose(np.asarray(loss), np.asarray(ref), rtol=2e-4, atol=1e-5)
    print("KERNEL_OK")
</pallas_src>

<mosaic_0001>
module attributes {stable_mosaic.version = 11 : i64} {
  func.func @_comb_sums_kernel(%arg0: i32, %arg1: i32, %arg2: memref<1x4x16x16xf32, #tpu.memory_space<vmem>>, %arg3: memref<1x4x16x16xf32, #tpu.memory_space<vmem>>, %arg4: memref<1x1x7x4xf32, #tpu.memory_space<vmem>>, %arg5: memref<4x20x20xf32, #tpu.memory_space<vmem>>) attributes {dimension_semantics = [#tpu.dimension_semantics<parallel>, #tpu.dimension_semantics<parallel>], iteration_bounds = array<i64: 2, 1>, scalar_prefetch = 0 : i64, scratch_operands = 1 : i64, tpu.core_type = #tpu.core_type<tc>, window_params = [{transform_indices = @transform_0, window_bounds = array<i64: 1, 4, 16, 16>}, {transform_indices = @transform_1, window_bounds = array<i64: 1, 4, 16, 16>}, {transform_indices = @transform_2, window_bounds = array<i64: 1, 1, 7, 4>}]} {
    %c0 = arith.constant 0 : index
    %c0_0 = arith.constant 0 : index
    %c0_1 = arith.constant 0 : index
    %c0_2 = arith.constant 0 : index
    %0 = vector.load %arg2[%c0, %c0_0, %c0_1, %c0_2] : memref<1x4x16x16xf32, #tpu.memory_space<vmem>>, vector<1x4x16x16xf32>
    %1 = vector.shape_cast %0 : vector<1x4x16x16xf32> to vector<4x16x16xf32>
    %c0_3 = arith.constant 0 : index
    %c0_4 = arith.constant 0 : index
    %c0_5 = arith.constant 0 : index
    %c0_6 = arith.constant 0 : index
    %2 = vector.load %arg3[%c0_3, %c0_4, %c0_5, %c0_6] : memref<1x4x16x16xf32, #tpu.memory_space<vmem>>, vector<1x4x16x16xf32>
    %3 = vector.shape_cast %2 : vector<1x4x16x16xf32> to vector<4x16x16xf32>
    %cst = arith.constant -1.000000e+30 : f32
    %4 = vector.broadcast %cst : f32 to vector<4x20x20xf32>
    %c0_7 = arith.constant 0 : index
    %c0_8 = arith.constant 0 : index
    %c0_9 = arith.constant 0 : index
    %5 = vector.load %arg5[%c0_7, %c0_8, %c0_9] : memref<4x20x20xf32, #tpu.memory_space<vmem>>, vector<4x20x20xf32>
    tpu.vector_store %arg5[%c0_7, %c0_8, %c0_9], %4 {strides = array<i32>} : memref<4x20x20xf32, #tpu.memory_space<vmem>>, vector<4x20x20xf32>,
    %cst_10 = arith.constant 1.000000e+00 : f32
    %6 = vector.broadcast %cst_10 : f32 to vector<4x16x16xf32>
    %7 = arith.subf %6, %1 : vector<4x16x16xf32>
    %cst_11 = arith.constant 1.000000e+00 : f32
    %8 = vector.broadcast %cst_11 : f32 to vector<4x16x16xf32>
    %9 = arith.subf %8, %3 : vector<4x16x16xf32>
    %c0_12 = arith.constant 0 : index
    %c2 = arith.constant 2 : index
    %c2_13 = arith.constant 2 : index
    %10 = vector.load %arg5[%c0_12, %c2, %c2_13] : memref<4x20x20xf32, #tpu.memory_space<vmem>>, vector<4x16x16xf32>
    tpu.vector_store %arg5[%c0_12, %c2, %c2_13], %7 {strides = array<i32>} : memref<4x20x20xf32, #tpu.memory_space<vmem>>, vector<4x16x16xf32>,
    %c0_14 = arith.constant 0 : index
    %c1 = arith.constant 1 : index
    %c1_15 = arith.constant 1 : index
    %11 = vector.load %arg5[%c0_14, %c1, %c1_15] : memref<4x20x20xf32, #tpu.memory_space<vmem>>, vector<4x18x16xf32>
    %c0_16 = arith.constant 0 : index
    %c1_17 = arith.constant 1 : index
    %c2_18 = arith.constant 2 : index
    %12 = vector.load %arg5[%c0_16, %c1_17, %c2_18] : memref<4x20x20xf32, #tpu.memory_space<vmem>>, vector<4x18x16xf32>
    %13 = arith.maximumf %11, %12 : vector<4x18x16xf32>
    %c0_19 = arith.constant 0 : index
    %c1_20 = arith.constant 1 : index
    %c3 = arith.constant 3 : index
    %14 = vector.load %arg5[%c0_19, %c1_20, %c3] : memref<4x20x20xf32, #tpu.memory_space<vmem>>, vector<4x18x16xf32>
    %15 = arith.maximumf %13, %14 : vector<4x18x16xf32>
    %16 = vector.extract_strided_slice %15 {offsets = [0, 0, 0], sizes = [4, 16, 16], strides = [1, 1, 1]} : vector<4x18x16xf32> to vector<4x16x16xf32>
    %17 = vector.extract_strided_slice %15 {offsets = [0, 1, 0], sizes = [4, 16, 16], strides = [1, 1, 1]} : vector<4x18x16xf32> to vector<4x16x16xf32>
    %18 = arith.maximumf %16, %17 : vector<4x16x16xf32>
    %19 = vector.extract_strided_slice %15 {offsets = [0, 2, 0], sizes = [4, 16, 16], strides = [1, 1, 1]} : vector<4x18x16xf32> to vector<4x16x16xf32>
    %20 = arith.maximumf %18, %19 : vector<4x16x16xf32>
    %21 = arith.subf %20, %7 : vector<4x16x16xf32>
    %c0_21 = arith.constant 0 : index
    %c2_22 = arith.constant 2 : index
    %c2_23 = arith.constant 2 : index
    %22 = vector.load %arg5[%c0_21, %c2_22, %c2_23] : memref<4x20x20xf32, #tpu.memory_space<vmem>>, vector<4x16x16xf32>
    tpu.vector_store %arg5[%c0_21, %c2_22, %c2_23], %9 {strides = array<i32>} : memref<4x20x20xf32, #tpu.memory_space<vmem>>, vector<4x16x16xf32>,
    %c0_24 = arith.constant 0 : index
    %c1_25 = arith.constant 1 : index
    %c1_26 = arith.constant 1 : index
    %23 = vector.load %arg5[%c0_24, %c1_25, %c1_26] : memref<4x20x20xf32, #tpu.memory_space<vmem>>, vector<4x18x16xf32>
    %c0_27 = arith.constant 0 : index
    %c1_28 = arith.constant 1 : index
    %c2_29 = arith.constant 2 : index
    %24 = vector.load %arg5[%c0_27, %c1_28, %c2_29] : memref<4x20x20xf32, #tpu.memory_space<vmem>>, vector<4x18x16xf32>
    %25 = arith.maximumf %23, %24 : vector<4x18x16xf32>
    %c0_30 = arith.constant 0 : index
    %c1_31 = arith.constant 1 : index
    %c3_32 = arith.constant 3 : index
    %26 = vector.load %arg5[%c0_30, %c1_31, %c3_32] : memref<4x20x20xf32, #tpu.memory_space<vmem>>, vector<4x18x16xf32>
    %27 = arith.maximumf %25, %26 : vector<4x18x16xf32>
    %28 = vector.extract_strided_slice %27 {offsets = [0, 0, 0], sizes = [4, 16, 16], strides = [1, 1, 1]} : vector<4x18x16xf32> to vector<4x16x16xf32>
    %29 = vector.extract_strided_slice %27 {offsets = [0, 1, 0], sizes = [4, 16, 16], strides = [1, 1, 1]} : vector<4x18x16xf32> to vector<4x16x16xf32>
    %30 = arith.maximumf %28, %29 : vector<4x16x16xf32>
    %31 = vector.extract_strided_slice %27 {offsets = [0, 2, 0], sizes = [4, 16, 16], strides = [1, 1, 1]} : vector<4x18x16xf32> to vector<4x16x16xf32>
    %32 = arith.maximumf %30, %31 : vector<4x16x16xf32>
    %33 = arith.subf %32, %9 : vector<4x16x16xf32>
    %c0_33 = arith.constant 0 : index
    %c2_34 = arith.constant 2 : index
    %c2_35 = arith.constant 2 : index
    %34 = vector.load %arg5[%c0_33, %c2_34, %c2_35] : memref<4x20x20xf32, #tpu.memory_space<vmem>>, vector<4x16x16xf32>
    tpu.vector_store %arg5[%c0_33, %c2_34, %c2_35], %21 {strides = array<i32>} : memref<4x20x20xf32, #tpu.memory_space<vmem>>, vector<4x16x16xf32>,
    %c0_36 = arith.constant 0 : index
    %c0_37 = arith.constant 0 : index
    %c0_38 = arith.constant 0 : index
    %35 = vector.load %arg5[%c0_36, %c0_37, %c0_38] : memref<4x20x20xf32, #tpu.memory_space<vmem>>, vector<4x20x16xf32>
    %c0_39 = arith.constant 0 : index
    %c0_40 = arith.constant 0 : index
    %c1_41 = arith.constant 1 : index
    %36 = vector.load %arg5[%c0_39, %c0_40, %c1_41] : memref<4x20x20xf32, #tpu.memory_space<vmem>>, vector<4x20x16xf32>
    %37 = arith.maximumf %35, %36 : vector<4x20x16xf32>
    %c0_42 = arith.constant 0 : index
    %c0_43 = arith.constant 0 : index
    %c2_44 = arith.constant 2 : index
    %38 = vector.load %arg5[%c0_42, %c0_43, %c2_44] : memref<4x20x20xf32, #tpu.memory_space<vmem>>, vector<4x20x16xf32>
    %39 = arith.maximumf %37, %38 : vector<4x20x16xf32>
    %c0_45 = arith.constant 0 : index
    %c0_46 = arith.constant 0 : index
    %c3_47 = arith.constant 3 : index
    %40 = vector.load %arg5[%c0_45, %c0_46, %c3_47] : memref<4x20x20xf32, #tpu.memory_space<vmem>>, vector<4x20x16xf32>
    %41 = arith.maximumf %39, %40 : vector<4x20x16xf32>
    %c0_48 = arith.constant 0 : index
    %c0_49 = arith.constant 0 : index
    %c4 = arith.constant 4 : index
    %42 = vector.load %arg5[%c0_48, %c0_49, %c4] : memref<4x20x20xf32, #tpu.memory_space<vmem>>, vector<4x20x16xf32>
    %43 = arith.maximumf %41, %42 : vector<4x20x16xf32>
    %44 = vector.extract_strided_slice %43 {offsets = [0, 0, 0], sizes = [4, 16, 16], strides = [1, 1, 1]} : vector<4x20x16xf32> to vector<4x16x16xf32>
    %45 = vector.extract_strided_slice %43 {offsets = [0, 1, 0], sizes = [4, 16, 16], strides = [1, 1, 1]} : vector<4x20x16xf32> to vector<4x16x16xf32>
    %46 = arith.maximumf %44, %45 : vector<4x16x16xf32>
    %47 = vector.extract_strided_slice %43 {offsets = [0, 2, 0], sizes = [4, 16, 16], strides = [1, 1, 1]} : vector<4x20x16xf32> to vector<4x16x16xf32>
    %48 = arith.maximumf %46, %47 : vector<4x16x16xf32>
    %49 = vector.extract_strided_slice %43 {offsets = [0, 3, 0], sizes = [4, 16, 16], strides = [1, 1, 1]} : vector<4x20x16xf32> to vector<4x16x16xf32>
    %50 = arith.maximumf %48, %49 : vector<4x16x16xf32>
    %51 = vector.extract_strided_slice %43 {offsets = [0, 4, 0], sizes = [4, 16, 16], strides = [1, 1, 1]} : vector<4x20x16xf32> to vector<4x16x16xf32>
    %52 = arith.maximumf %50, %51 : vector<4x16x16xf32>
    %c0_50 = arith.constant 0 : index
    %c2_51 = arith.constant 2 : index
    %c2_52 = arith.constant 2 : index
    %53 = vector.load %arg5[%c0_50, %c2_51, %c2_52] : memref<4x20x20xf32, #tpu.memory_space<vmem>>, vector<4x16x16xf32>
    tpu.vector_store %arg5[%c0_50, %c2_51, %c2_52], %33 {strides = array<i32>} : memref<4x20x20xf32, #tpu.memory_space<vmem>>, vector<4x16x16xf32>,
    %c0_53 = arith.constant 0 : index
    %c0_54 = arith.constant 0 : index
    %c0_55 = arith.constant 0 : index
    %54 = vector.load %arg5[%c0_53, %c0_54, %c0_55] : memref<4x20x20xf32, #tpu.memory_space<vmem>>, vector<4x20x16xf32>
    %c0_56 = arith.constant 0 : index
    %c0_57 = arith.constant 0 : index
    %c1_58 = arith.constant 1 : index
    %55 = vector.load %arg5[%c0_56, %c0_57, %c1_58] : memref<4x20x20xf32, #tpu.memory_space<vmem>>, vector<4x20x16xf32>
    %56 = arith.maximumf %54, %55 : vector<4x20x16xf32>
    %c0_59 = arith.constant 0 : index
    %c0_60 = arith.constant 0 : index
    %c2_61 = arith.constant 2 : index
    %57 = vector.load %arg5[%c0_59, %c0_60, %c2_61] : memref<4x20x20xf32, #tpu.memory_space<vmem>>, vector<4x20x16xf32>
    %58 = arith.maximumf %56, %57 : vector<4x20x16xf32>
    %c0_62 = arith.constant 0 : index
    %c0_63 = arith.constant 0 : index
    %c3_64 = arith.constant 3 : index
    %59 = vector.load %arg5[%c0_62, %c0_63, %c3_64] : memref<4x20x20xf32, #tpu.memory_space<vmem>>, vector<4x20x16xf32>
    %60 = arith.maximumf %58, %59 : vector<4x20x16xf32>
    %c0_65 = arith.constant 0 : index
    %c0_66 = arith.constant 0 : index
    %c4_67 = arith.constant 4 : index
    %61 = vector.load %arg5[%c0_65, %c0_66, %c4_67] : memref<4x20x20xf32, #tpu.memory_space<vmem>>, vector<4x20x16xf32>
    %62 = arith.maximumf %60, %61 : vector<4x20x16xf32>
    %63 = vector.extract_strided_slice %62 {offsets = [0, 0, 0], sizes = [4, 16, 16], strides = [1, 1, 1]} : vector<4x20x16xf32> to vector<4x16x16xf32>
    %64 = vector.extract_strided_slice %62 {offsets = [0, 1, 0], sizes = [4, 16, 16], strides = [1, 1, 1]} : vector<4x20x16xf32> to vector<4x16x16xf32>
    %65 = arith.maximumf %63, %64 : vector<4x16x16xf32>
    %66 = vector.extract_strided_slice %62 {offsets = [0, 2, 0], sizes = [4, 16, 16], strides = [1, 1, 1]} : vector<4x20x16xf32> to vector<4x16x16xf32>
    %67 = arith.maximumf %65, %66 : vector<4x16x16xf32>
    %68 = vector.extract_strided_slice %62 {offsets = [0, 3, 0], sizes = [4, 16, 16], strides = [1, 1, 1]} : vector<4x20x16xf32> to vector<4x16x16xf32>
    %69 = arith.maximumf %67, %68 : vector<4x16x16xf32>
    %70 = vector.extract_strided_slice %62 {offsets = [0, 4, 0], sizes = [4, 16, 16], strides = [1, 1, 1]} : vector<4x20x16xf32> to vector<4x16x16xf32>
    %71 = arith.maximumf %69, %70 : vector<4x16x16xf32>
    %72 = arith.mulf %1, %3 : vector<4x16x16xf32>
    %cst_68 = arith.constant dense<0.000000e+00> : vector<4x16xf32>
    %73 = vector.multi_reduction <add>, %72, %cst_68 [2] : vector<4x16x16xf32> to vector<4x16xf32>
    %cst_69 = arith.constant dense<0.000000e+00> : vector<4xf32>
    %74 = vector.multi_reduction <add>, %73, %cst_69 [1] : vector<4x16xf32> to vector<4xf32>
    %cst_70 = arith.constant dense<0.000000e+00> : vector<4x16xf32>
    %75 = vector.multi_reduction <add>, %1, %cst_70 [2] : vector<4x16x16xf32> to vector<4x16xf32>
    %cst_71 = arith.constant dense<0.000000e+00> : vector<4xf32>
    %76 = vector.multi_reduction <add>, %75, %cst_71 [1] : vector<4x16xf32> to vector<4xf32>
    %cst_72 = arith.constant dense<0.000000e+00> : vector<4x16xf32>
    %77 = vector.multi_reduction <add>, %3, %cst_72 [2] : vector<4x16x16xf32> to vector<4x16xf32>
    %cst_73 = arith.constant dense<0.000000e+00> : vector<4xf32>
    %78 = vector.multi_reduction <add>, %77, %cst_73 [1] : vector<4x16xf32> to vector<4xf32>
    %79 = arith.mulf %21, %71 : vector<4x16x16xf32>
    %cst_74 = arith.constant dense<0.000000e+00> : vector<4x16xf32>
    %80 = vector.multi_reduction <add>, %79, %cst_74 [2] : vector<4x16x16xf32> to vector<4x16xf32>
    %cst_75 = arith.constant dense<0.000000e+00> : vector<4xf32>
    %81 = vector.multi_reduction <add>, %80, %cst_75 [1] : vector<4x16xf32> to vector<4xf32>
    %cst_76 = arith.constant dense<0.000000e+00> : vector<4x16xf32>
    %82 = vector.multi_reduction <add>, %21, %cst_76 [2] : vector<4x16x16xf32> to vector<4x16xf32>
    %cst_77 = arith.constant dense<0.000000e+00> : vector<4xf32>
    %83 = vector.multi_reduction <add>, %82, %cst_77 [1] : vector<4x16xf32> to vector<4xf32>
    %84 = arith.mulf %52, %33 : vector<4x16x16xf32>
    %cst_78 = arith.constant dense<0.000000e+00> : vector<4x16xf32>
    %85 = vector.multi_reduction <add>, %84, %cst_78 [2] : vector<4x16x16xf32> to vector<4x16xf32>
    %cst_79 = arith.constant dense<0.000000e+00> : vector<4xf32>
    %86 = vector.multi_reduction <add>, %85, %cst_79 [1] : vector<4x16xf32> to vector<4xf32>
    %cst_80 = arith.constant dense<0.000000e+00> : vector<4x16xf32>
    %87 = vector.multi_reduction <add>, %33, %cst_80 [2] : vector<4x16x16xf32> to vector<4x16xf32>
    %cst_81 = arith.constant dense<0.000000e+00> : vector<4xf32>
    %88 = vector.multi_reduction <add>, %87, %cst_81 [1] : vector<4x16xf32> to vector<4xf32>
    %89 = vector.shape_cast %74 : vector<4xf32> to vector<1x4xf32>
    %c0_82 = arith.constant 0 : index
    %c0_83 = arith.constant 0 : index
    %c0_84 = arith.constant 0 : index
    %c0_85 = arith.constant 0 : index
    %90 = vector.load %arg4[%c0_82, %c0_83, %c0_84, %c0_85] : memref<1x1x7x4xf32, #tpu.memory_space<vmem>>, vector<1x1x1x4xf32>
    %91 = vector.shape_cast %90 : vector<1x1x1x4xf32> to vector<1x4xf32>
    %92 = vector.shape_cast %89 : vector<1x4xf32> to vector<1x1x1x4xf32>
    tpu.vector_store %arg4[%c0_82, %c0_83, %c0_84, %c0_85], %92 {strides = array<i32>} : memref<1x1x7x4xf32, #tpu.memory_space<vmem>>, vector<1x1x1x4xf32>,
    %93 = vector.shape_cast %76 : vector<4xf32> to vector<1x4xf32>
    %c0_86 = arith.constant 0 : index
    %c0_87 = arith.constant 0 : index
    %c1_88 = arith.constant 1 : index
    %c0_89 = arith.constant 0 : index
    %94 = vector.load %arg4[%c0_86, %c0_87, %c1_88, %c0_89] : memref<1x1x7x4xf32, #tpu.memory_space<vmem>>, vector<1x1x1x4xf32>
    %95 = vector.shape_cast %94 : vector<1x1x1x4xf32> to vector<1x4xf32>
    %96 = vector.shape_cast %93 : vector<1x4xf32> to vector<1x1x1x4xf32>
    tpu.vector_store %arg4[%c0_86, %c0_87, %c1_88, %c0_89], %96 {strides = array<i32>} : memref<1x1x7x4xf32, #tpu.memory_space<vmem>>, vector<1x1x1x4xf32>,
    %97 = vector.shape_cast %78 : vector<4xf32> to vector<1x4xf32>
    %c0_90 = arith.constant 0 : index
    %c0_91 = arith.constant 0 : index
    %c2_92 = arith.constant 2 : index
    %c0_93 = arith.constant 0 : index
    %98 = vector.load %arg4[%c0_90, %c0_91, %c2_92, %c0_93] : memref<1x1x7x4xf32, #tpu.memory_space<vmem>>, vector<1x1x1x4xf32>
    %99 = vector.shape_cast %98 : vector<1x1x1x4xf32> to vector<1x4xf32>
    %100 = vector.shape_cast %97 : vector<1x4xf32> to vector<1x1x1x4xf32>
    tpu.vector_store %arg4[%c0_90, %c0_91, %c2_92, %c0_93], %100 {strides = array<i32>} : memref<1x1x7x4xf32, #tpu.memory_space<vmem>>, vector<1x1x1x4xf32>,
    %101 = vector.shape_cast %81 : vector<4xf32> to vector<1x4xf32>
    %c0_94 = arith.constant 0 : index
    %c0_95 = arith.constant 0 : index
    %c3_96 = arith.constant 3 : index
    %c0_97 = arith.constant 0 : index
    %102 = vector.load %arg4[%c0_94, %c0_95, %c3_96, %c0_97] : memref<1x1x7x4xf32, #tpu.memory_space<vmem>>, vector<1x1x1x4xf32>
    %103 = vector.shape_cast %102 : vector<1x1x1x4xf32> to vector<1x4xf32>
    %104 = vector.shape_cast %101 : vector<1x4xf32> to vector<1x1x1x4xf32>
    tpu.vector_store %arg4[%c0_94, %c0_95, %c3_96, %c0_97], %104 {strides = array<i32>} : memref<1x1x7x4xf32, #tpu.memory_space<vmem>>, vector<1x1x1x4xf32>,
    %105 = vector.shape_cast %83 : vector<4xf32> to vector<1x4xf32>
    %c0_98 = arith.constant 0 : index
    %c0_99 = arith.constant 0 : index
    %c4_100 = arith.constant 4 : index
    %c0_101 = arith.constant 0 : index
    %106 = vector.load %arg4[%c0_98, %c0_99, %c4_100, %c0_101] : memref<1x1x7x4xf32, #tpu.memory_space<vmem>>, vector<1x1x1x4xf32>
    %107 = vector.shape_cast %106 : vector<1x1x1x4xf32> to vector<1x4xf32>
    %108 = vector.shape_cast %105 : vector<1x4xf32> to vector<1x1x1x4xf32>
    tpu.vector_store %arg4[%c0_98, %c0_99, %c4_100, %c0_101], %108 {strides = array<i32>} : memref<1x1x7x4xf32, #tpu.memory_space<vmem>>, vector<1x1x1x4xf32>,
    %109 = vector.shape_cast %86 : vector<4xf32> to vector<1x4xf32>
    %c0_102 = arith.constant 0 : index
    %c0_103 = arith.constant 0 : index
    %c5 = arith.constant 5 : index
    %c0_104 = arith.constant 0 : index
    %110 = vector.load %arg4[%c0_102, %c0_103, %c5, %c0_104] : memref<1x1x7x4xf32, #tpu.memory_space<vmem>>, vector<1x1x1x4xf32>
    %111 = vector.shape_cast %110 : vector<1x1x1x4xf32> to vector<1x4xf32>
    %112 = vector.shape_cast %109 : vector<1x4xf32> to vector<1x1x1x4xf32>
    tpu.vector_store %arg4[%c0_102, %c0_103, %c5, %c0_104], %112 {strides = array<i32>} : memref<1x1x7x4xf32, #tpu.memory_space<vmem>>, vector<1x1x1x4xf32>,
    %113 = vector.shape_cast %88 : vector<4xf32> to vector<1x4xf32>
    %c0_105 = arith.constant 0 : index
    %c0_106 = arith.constant 0 : index
    %c6 = arith.constant 6 : index
    %c0_107 = arith.constant 0 : index
    %114 = vector.load %arg4[%c0_105, %c0_106, %c6, %c0_107] : memref<1x1x7x4xf32, #tpu.memory_space<vmem>>, vector<1x1x1x4xf32>
    %115 = vector.shape_cast %114 : vector<1x1x1x4xf32> to vector<1x4xf32>
    %116 = vector.shape_cast %113 : vector<1x4xf32> to vector<1x1x1x4xf32>
    tpu.vector_store %arg4[%c0_105, %c0_106, %c6, %c0_107], %116 {strides = array<i32>} : memref<1x1x7x4xf32, #tpu.memory_space<vmem>>, vector<1x1x1x4xf32>,
    return
  }
  func.func @transform_0(%arg0: i32, %arg1: i32) -> (i32, i32, i32, i32) {
    %c0_i32 = arith.constant 0 : i32
    %c0_i32_0 = arith.constant 0 : i32
    %c0_i32_1 = arith.constant 0 : i32
    return %arg0, %arg1, %c0_i32, %c0_i32_0 : i32, i32, i32, i32
  }
  func.func @transform_1(%arg0: i32, %arg1: i32) -> (i32, i32, i32, i32) {
    %c0_i32 = arith.constant 0 : i32
    %c0_i32_0 = arith.constant 0 : i32
    %c0_i32_1 = arith.constant 0 : i32
    return %arg0, %arg1, %c0_i32, %c0_i32_0 : i32, i32, i32, i32
  }
  func.func @transform_2(%arg0: i32, %arg1: i32) -> (i32, i32, i32, i32) {
    %c0_i32 = arith.constant 0 : i32
    %c0_i32_0 = arith.constant 0 : i32
    %c0_i32_1 = arith.constant 0 : i32
    return %arg0, %arg1, %c0_i32, %c0_i32_0 : i32, i32, i32, i32
  }
}

</mosaic_0001>

<bundles_post_ra>
// kernel: tpu_custom_call.1
= control target key start
LH: loop header
LB: loop body
LE: loop exit
PB: predicated region body
PF: predicated region fallthrough
CT: control target
= control target key end

     0   :  { %7 = vsyncpa [#allocation4], 0  ;;  %s4100_s0 = inlined_call_operand.hbm [shape: f32[2,4,16,16], index: 0, kind: input, shape index: {}]   ;;  %s4101_s1 = inlined_call_operand.hbm [shape: f32[2,4,16,16], index: 1, kind: input, shape index: {}]   ;;  %s4102_s2 = inlined_call_operand.vmem [shape: f32[2,1,7,4], index: 2, kind: output, shape index: {}]  }
   0x1   :  { %9 = vsyncpa [#allocation4 + $0x1], 0 }
   0x2   :  { %10 = vsyncpa [#allocation6], 0 }
   0x3   :  { %12 = vsyncpa [#allocation6 + $0x1], 0  ;;  %s2551_s9 = smov 0   ;;  %s2553_s10 = smov 0  }
   0x4   :  { %s2555_s11 = smov 0   ;;  %s2557_s12 = smov 0  }
   0x5   :  { %s2559_s13 = smov 0   ;;  %s2561_s14 = smov 0  }
   0x6 LB: > { %s2308_s15 = sadd.s32 4294967295, %s2525_s14   ;;  %s30_s16 = sadd.s32 1, %s2521_s13  ;;  %s2525_s14 = sphi %s2561_s14, %s18_s14   ;;  %s2521_s13 = sphi %s2559_s13, %s4216_s13   ;;  %s2517_s12 = sphi %s2557_s12, %s4215_s12   ;;  %s2513_s11 = sphi %s2555_s11, %s4214_s11   ;;  %s2509_s10 = sphi %s2553_s10, %s4213_s10   ;;  %s2505_s9 = sphi %s2551_s9, %s4212_s9  }
   0x7   : > { %p32_p0 = scmp.ge.s32.totalorder %s30_s16, 2  ;;  %s39_s17 = sadd.s32 1, %s2513_s11 }
   0x8   : > { %p46_p1 = scmp.ne.s32.totalorder %s2513_s11, %s2509_s10  ;;  %p47_p2 = scmp.eq.s32.totalorder %s2525_s14, 0 }
   0x9   : > { %s4218_s16 = smov (%p32_p0, %s30_s16), 0  ;;  %p52_p4 = scmp.ne.s32.totalorder %s2509_s10, %s2505_s9 }
   0xa   : > { %p2587_p3 = por %p47_p2, %p46_p1  ;;  %s34_s19 = ssub.s32 %s2521_s13, %s4218_s16 }
   0xb   : > { %p53_p5 = scmp.eq.s32.totalorder %s2308_s15, 0  ;;  %p37_p6 = scmp.eq.s32.totalorder %s34_s19, 0 }
   0xc   : > { %p2337_p8 = scmp.lt.s32.totalorder %s2525_s14, 2  ;;  %s2603_s22 = sand.u32 1, %s2513_s11  }
   0xd   : > { %p2594_p7 = por %p53_p5, %p52_p4  ;;  %s2324_s23 = sshll.u32 %s2521_s13, 6 }
   0xe   : > { %s2600_s21 = scalar_select %p37_p6, %s2513_s11, %s39_s17  }
   0xf   : > { %s2312_s24 = sshll.u32 %s2603_s22, 6  ;;  %s144_s27 = scalar_lea.hbm %s4100_s0, %s2324_s23 }
  0x10   : > { %s145_s28 = sshll.u32 %s144_s27, 4  ;;  %s136_s29 = scalar_lea.vmem [#allocation3], %s2312_s24  ;;  %s146_s28 = int_to_ptr.hbm [resolvable:$true] %s145_s28 }
  0x11   : > { %s147_s30 = sshll.u32 %s136_s29, 4  ;;  %p2612_p9 = pnand %p2337_p8, %p2587_p3  ;;  %s148_s30 = int_to_ptr.vmem [resolvable:$true] %s147_s30 }
  0x12   : > { %p2318_p10 = scmp.ge.s32.totalorder %s2525_s14, 1  ;;  %p180_p11 = scmp.lt.s32.totalorder %s2525_s14, 3 }
  0x13   : > { %s133_s4 = scalar_lea.sflag [#allocation4], %s2603_s22  ;;  %s2527_s5 = smov 128  }
  0x14   : > { %s2528_s6 = smov 8   ;;  %p181_p12 = pnand %p2318_p10, %p180_p11 }
  0x15   : > { %2333 = dma.hbm_to_vmem [thread:$0]  (!%p2612_p9), %s146_s28, 1024, %s148_s30, %s133_s4, %s2527_s5, %s2527_s5, %s2528_s6  }
  0x16   : > { %s169_s9 = scalar_lea.hbm %s4101_s1, %s2324_s23  ;;  %s161_s17 = scalar_lea.vmem [#allocation5], %s2312_s24 }
  0x17   : > { %s170_s15 = sshll.u32 %s169_s9, 4  ;;  %s172_s18 = sshll.u32 %s161_s17, 4  ;;  %s171_s15 = int_to_ptr.hbm [resolvable:$true] %s170_s15  ;;  %s173_s18 = int_to_ptr.vmem [resolvable:$true] %s172_s18 }
  0x18   : > { %s158_s19 = scalar_lea.sflag [#allocation6], %s2603_s22  ;;  %184 = sbr.rel (%p181_p12) target bundleno = 1824 (0x720), region = 28 }
  0x19   : > { %2336 = dma.hbm_to_vmem [thread:$0]  (!%p2612_p9), %s171_s15, 1024, %s173_s18, %s158_s19, %s2527_s5, %s2527_s5, %s2528_s6  }
  0x1d   : > { %s186_s25 = sand.u32 1, %s2509_s10  }
  0x1e   : > { %s2319_s26 = sshll.u32 %s186_s25, 6  ;;  %s187_s27 = scalar_lea.sflag [#allocation4], %s186_s25 }
  0x1f   : > { %s2628_s28 = scalar_lea.vmem [#allocation3], %s2319_s26 }
  0x20   : > { %2496 = dma.done.wait (%p2594_p7), %s187_s27, 1024  }
  0x21   : > { %2498 = vsyncadd (%p2594_p7), %s187_s27, 4294966272  ;;  %s197_s23 = scalar_lea.sflag [#allocation6], %s186_s25  ;;  %s2634_s24 = scalar_lea.vmem [#allocation5], %s2319_s26 }
  0x22   : > { %2500 = dma.done.wait (%p2594_p7), %s197_s23, 1024  }
  0x23   : > { %2502 = vsyncadd (%p2594_p7), %s197_s23, 4294966272  ;;  %v240_v0 = vld [vmem:[%s2628_s28 + $0x10] sm:$0xff]  ;;  %v238_v1 = vld [vmem:[%s2628_s28] sm:$0xff]  ;;  %s2529_s22 = smov 2   ;;  %s2530_s20 = smov 1   ;;  %vm254_vm0 = vcmask 162816  }
  0x24   : > { %v270_v2 = vsub.f32 1.0, %v240_v0  ;;  %v268_v3 = vsub.f32 1.0, %v238_v1  ;;  %v242_v4 = vld [vmem:[%s2628_s28 + $0x20] sm:$0xff]  ;;  %v241_v6 = vld [vmem:[%s2628_s28 + $0x18] sm:$0xff]  ;;  %v239_v7 = vld [vmem:[%s2628_s28 + $0x8] sm:$0xff]  ;;  %vm257_vm1 = vcmask 158720  }
  0x25   : > { %v272_v5 = vsub.f32 1.0, %v242_v4  ;;  %v243_v8 = vld [vmem:[%s2628_s28 + $0x28] sm:$0xff]  ;;  %v271_v9 = vsub.f32 1.0, %v241_v6  ;;  %v269_v10 = vsub.f32 1.0, %v239_v7  ;;  %v244_v12 = vld [vmem:[%s2628_s28 + $0x30] sm:$0xff]  ;;  %v245_v13 = vld [vmem:[%s2628_s28 + $0x38] sm:$0xff] }
  0x26   : > { %296 = vrot.lane.b32.xlu1 %v270_v2, %s2529_s22  ;;  %292 = vrot.lane.b32.xlu0 %v268_v3, %s2529_s22  ;;  %v273_v11 = vsub.f32 1.0, %v243_v8  ;;  %v274_v14 = vsub.f32 1.0, %v244_v12  ;;  %v275_v15 = vsub.f32 1.0, %v245_v13  ;;  %v2531_v16 = vmov -1e+30   ;;  %v2663_v17 = vld [vmem:[%s2634_s24] sm:$0xff] }
  0x27   : > { %300 = vrot.lane.b32.xlu2 %v272_v5, %s2529_s22  ;;  %259 = vst.msk [vmem:[#allocation2 + $0x18] sm:$0xff] %vm254_vm0, %v2531_v16  ;;  %v2667_v18 = vld [vmem:[%s2634_s24 + $0x8] sm:$0xff]  ;;  %v276_v19 = vsub.f32 1.0, %v2663_v17  ;;  %v2676_v21 = vld [vmem:[%s2634_s24 + $0x18] sm:$0xff]  ;;  %v2679_v22 = vld [vmem:[%s2634_s24 + $0x10] sm:$0xff]  ;;  %vm316_vm2 = vcmask 146448  }
  0x28   : > { %260 = vst.msk [vmem:[#allocation2 + $0x20] sm:$0xff] %vm254_vm0, %v2531_v16  ;;  %v277_v20 = vsub.f32 1.0, %v2667_v18  ;;  %v2685_v23 = vld [vmem:[%s2634_s24 + $0x20] sm:$0xff]  ;;  %v279_v24 = vsub.f32 1.0, %v2676_v21  ;;  %v278_v25 = vsub.f32 1.0, %v2679_v22  ;;  %v2697_v27 = vld [vmem:[%s2634_s24 + $0x28] sm:$0xff] }
  0x29   : > { %255 = vst.msk [vmem:[#allocation2] sm:$0xff] %vm254_vm0, %v2531_v16  ;;  %v280_v26 = vsub.f32 1.0, %v2685_v23  ;;  %v2700_v28 = vld [vmem:[%s2634_s24 + $0x30] sm:$0xff]  ;;  %v2706_v29 = vld [vmem:[%s2634_s24 + $0x38] sm:$0xff]  ;;  %v281_v30 = vsub.f32 1.0, %v2697_v27  ;;  %s2532_s29 = smov 127  }
  0x2a   : > { %256 = vst.msk [vmem:[#allocation2 + $0x8] sm:$0xff] %vm254_vm0, %v2531_v16  ;;  %v282_v31 = vsub.f32 1.0, %v2700_v28  ;;  %v283_v32 = vsub.f32 1.0, %v2706_v29  ;;  %s2533_s30 = smov 126   ;;  %vm457_vm3 = vcmask 1046528   ;;  %vm494_vm4 = vcmask 1045504  }
  0x2b   : > { %262 = vst.msk [vmem:[#allocation2 + $0x30] sm:$0xff] %vm254_vm0, %v2531_v16  ;;  %s2534_s3 = smov 125   ;;  %s2535_s4 = smov 124   ;;  %vm1179_vm5 = vcmask 1044480   ;;  %vm1216_vm6 = vcmask 1043456   ;;  %vm1673_vm7 = vcmask 130048  }
  0x2c   : > { %263 = vst.msk [vmem:[#allocation2 + $0x38] sm:$0xff] %vm254_vm0, %v2531_v16  ;;  %vm1711_vm8 = vcmask 130112   ;;  %vm1722_vm9 = vcmask 1041409   ;;  %vm1724_vm10 = vcmask 1042434   ;;  %vm1726_vm11 = vcmask 1043459   ;;  %p231_p13 = scmp.lt.s32.totalorder %s2517_s12, 1 }
  0x2d   : > { %265 = vst.msk [vmem:[#allocation2 + $0x48] sm:$0xff] %vm254_vm0, %v2531_v16  ;;  %vm1729_vm12 = vcmask 125952   ;;  %vm2170_vm13 = vcmask 24576  }
  0x2e   : > { %298 = vrot.lane.b32.xlu1 %v271_v9, %s2529_s22  ;;  %294 = vrot.lane.b32.xlu0 %v269_v10, %s2529_s22  ;;  %266 = vst.msk [vmem:[#allocation2 + $0x50] sm:$0xff] %vm254_vm0, %v2531_v16  ;;  %s4220_s12 = smov (!%p231_p13, %s2517_s12), 1 }
  0x2f   : > { %302 = vrot.lane.b32.xlu2 %v273_v11, %s2529_s22  ;;  %261 = vst.msk [vmem:[#allocation2 + $0x28] sm:$0xf] %vm257_vm1, %v2531_v16  ;;  %s2321_s5 = sshll.u32 %s4220_s12, 3 }
  0x30   : > { %258 = vst.msk [vmem:[#allocation2 + $0x10] sm:$0xf] %vm257_vm1, %v2531_v16  ;;  %s3796_s8 = scalar_lea.vmem %s4102_s2, %s2321_s5 }
  0x31   : > { %264 = vst.msk [vmem:[#allocation2 + $0x40] sm:$0xf] %vm257_vm1, %v2531_v16 }
  0x32   : > { %267 = vst.msk [vmem:[#allocation2 + $0x58] sm:$0xf] %vm257_vm1, %v2531_v16 }
  0x36   : > { %304 = vrot.lane.b32.xlu0 %v274_v14, %s2529_s22  ;;  %306 = vrot.lane.b32.xlu1 %v275_v15, %s2529_s22 }
  0x37   : > { %531 = vrot.lane.b32.xlu2 %v268_v3, %s2530_s20 }
  0x3e   : > { %535 = vrot.lane.b32.xlu1 %v270_v2, %s2530_s20  ;;  %533 = vrot.lane.b32.xlu0 %v269_v10, %s2530_s20 }
  0x3f   : > { %537 = vrot.lane.b32.xlu2 %v271_v9, %s2530_s20 }
  0x46   : > { %541 = vrot.lane.b32.xlu1 %v273_v11, %s2530_s20  ;;  %539 = vrot.lane.b32.xlu0 %v272_v5, %s2530_s20 }
  0x47   : > { %543 = vrot.lane.b32.xlu2 %v274_v14, %s2530_s20 }
  0x4e   : > { %571 = vrot.lane.b32.xlu1 %v276_v19, %s2529_s22  ;;  %545 = vrot.lane.b32.xlu0 %v275_v15, %s2530_s20 }
  0x4f   : > { %573 = vrot.lane.b32.xlu2 %v277_v20, %s2529_s22 }
  0x56   : > { %577 = vrot.lane.b32.xlu1 %v279_v24, %s2529_s22  ;;  %575 = vrot.lane.b32.xlu0 %v278_v25, %s2529_s22 }
  0x57   : > { %579 = vrot.lane.b32.xlu2 %v280_v26, %s2529_s22 }
  0x5e   : > { %581 = vrot.lane.b32.xlu0 %v281_v30, %s2529_s22  ;;  %583 = vrot.lane.b32.xlu1 %v282_v31, %s2529_s22 }
  0x5f   : > { %585 = vrot.lane.b32.xlu2 %v283_v32, %s2529_s22 }
  0x81   : > { %v301_v33 = vpop.permute.xlu2 %300 }
  0x82   : > { %321 = vst.msk [vmem:[#allocation2 + $0x32] sm:$0xff] %vm316_vm2, %v301_v33 }
  0x89   : > { %v303_v34 = vpop.permute.xlu2 %302  ;;  %v2750_v48 = vld [vmem:[#allocation2 + $0x31] sm:$0xff] }
  0x8a   : > { %322 = vst.msk [vmem:[#allocation2 + $0x3a] sm:$0xff] %vm316_vm2, %v303_v34 }
  0x91   : > { %v2724_v37 = vpop.permute.xlu2 %531  ;;  %v2767_v54 = vld [vmem:[#allocation2 + $0x41] sm:$0x3]  ;;  %v2777_v58 = vld [vmem:[#allocation2 + $0x39] sm:$0xff] }
  0x98   : > { %v297_v35 = vpop.permute.xlu1 %296  ;;  %v293_v36 = vpop.permute.xlu0 %292 }
  0x99   : > { %319 = vst.msk [vmem:[#allocation2 + $0x1a] sm:$0xff] %vm316_vm2, %v297_v35  ;;  %v2732_v41 = vpop.permute.xlu2 %537 }
  0x9a   : > { %317 = vst.msk [vmem:[#allocation2 + $0x2] sm:$0xff] %vm316_vm2, %v293_v36 }
  0xa0   : > { %v299_v38 = vpop.permute.xlu1 %298  ;;  %v295_v39 = vpop.permute.xlu0 %294  ;;  %v2734_v42 = vld [vmem:[#allocation2 + $0x19] sm:$0xff] }
  0xa1   : > { %320 = vst.msk [vmem:[#allocation2 + $0x22] sm:$0xff] %vm316_vm2, %v299_v38  ;;  %v2727_v40 = vld [vmem:[#allocation2 + $0x1] sm:$0xff]  ;;  %v2748_v47 = vpop.permute.xlu2 %543 }
  0xa2   : > { %318 = vst.msk [vmem:[#allocation2 + $0xa] sm:$0xff] %vm316_vm2, %v295_v39  ;;  %349 = vrot.lane.b32.xlu2 %v2727_v40, %s2532_s29 }
  0xa8   : > { %v305_v43 = vpop.permute.xlu0 %304  ;;  %v307_v44 = vpop.permute.xlu1 %306  ;;  %v2752_v49 = vld [vmem:[#allocation2 + $0x29] sm:$0x3]  ;;  %v2762_v52 = vld [vmem:[#allocation2 + $0x21] sm:$0xff] }
  0xa9   : > { %v2736_v45 = vld [vmem:[#allocation2 + $0x11] sm:$0x3]  ;;  %v2738_v46 = vld [vmem:[#allocation2 + $0x9] sm:$0xff]  ;;  %323 = vst.msk [vmem:[#allocation2 + $0x4a] sm:$0xff] %vm316_vm2, %v305_v43  ;;  %v574_v53 = vpop.permute.xlu2 %573 }
  0xaa   : > { %355 = vrot.lane.b32.xlu2 %v2734_v42, %s2532_s29  ;;  %353 = vrot.lane.b32.xlu1 %v2736_v45, %s2532_s29  ;;  %324 = vst.msk [vmem:[#allocation2 + $0x52] sm:$0xff] %vm316_vm2, %v307_v44 }
  0xab   : > { %351 = vrot.lane.b32.xlu0 %v2738_v46, %s2532_s29  ;;  %596 = vst.msk [vmem:[#allocation2 + $0xa] sm:$0xff] %vm316_vm2, %v574_v53 }
  0xb0   : > { %v2754_v50 = vpop.permute.xlu1 %535  ;;  %v2756_v51 = vpop.permute.xlu0 %533  ;;  %v2769_v55 = vld [vmem:[#allocation2 + $0x49] sm:$0xff] }
  0xb1   : > { %v2783_v59 = vld [vmem:[#allocation2 + $0x59] sm:$0x3]  ;;  %v2785_v60 = vld [vmem:[#allocation2 + $0x51] sm:$0xff]  ;;  %v580_v63 = vpop.permute.xlu2 %579 }
  0xb2   : > { %361 = vrot.lane.b32.xlu2 %v2750_v48, %s2532_s29  ;;  %359 = vrot.lane.b32.xlu1 %v2752_v49, %s2532_s29  ;;  %599 = vst.msk [vmem:[#allocation2 + $0x32] sm:$0xff] %vm316_vm2, %v580_v63  ;;  %v2820_v5 = vld [vmem:[#allocation2 + $0x11] sm:$0x3] }
  0xb3   : > { %357 = vrot.lane.b32.xlu0 %v2762_v52, %s2532_s29 }
  0xb8   : > { %v2771_v56 = vpop.permute.xlu1 %541  ;;  %v2773_v57 = vpop.permute.xlu0 %539 }
  0xb9   : > { %v586_v2 = vpop.permute.xlu2 %585  ;;  %v2856_v14 = vld [vmem:[#allocation2 + $0x31] sm:$0xff] }
  0xba   : > { %365 = vrot.lane.b32.xlu1 %v2767_v54, %s2532_s29  ;;  %367 = vrot.lane.b32.xlu2 %v2769_v55, %s2532_s29  ;;  %602 = vst.msk [vmem:[#allocation2 + $0x52] sm:$0xff] %vm316_vm2, %v586_v2 }
  0xbb   : > { %363 = vrot.lane.b32.xlu0 %v2777_v58, %s2532_s29 }
  0xc0   : > { %v572_v61 = vpop.permute.xlu1 %571  ;;  %v2787_v62 = vpop.permute.xlu0 %545 }
  0xc1   : > { %595 = vst.msk [vmem:[#allocation2 + $0x2] sm:$0xff] %vm316_vm2, %v572_v61  ;;  %v2852_v12 = vld [vmem:[#allocation2 + $0x59] sm:$0x3] }
  0xc2   : > { %371 = vrot.lane.b32.xlu1 %v2783_v59, %s2532_s29  ;;  %397 = vrot.lane.b32.xlu2 %v2727_v40, %s2533_s30 }
  0xc3   : > { %369 = vrot.lane.b32.xlu0 %v2785_v60, %s2532_s29 }
  0xc8   : > { %v578_v0 = vpop.permute.xlu1 %577  ;;  %v576_v1 = vpop.permute.xlu0 %575  ;;  %v2828_v6 = vld [vmem:[#allocation2 + $0x9] sm:$0xff]  ;;  %v2832_v8 = vld [vmem:[#allocation2 + $0x1] sm:$0xff] }
  0xc9   : > { %598 = vst.msk [vmem:[#allocation2 + $0x22] sm:$0xff] %vm316_vm2, %v578_v0 }
  0xca   : > { %401 = vrot.lane.b32.xlu1 %v2736_v45, %s2533_s30  ;;  %403 = vrot.lane.b32.xlu2 %v2734_v42, %s2533_s30  ;;  %597 = vst.msk [vmem:[#allocation2 + $0x1a] sm:$0xff] %vm316_vm2, %v576_v1 }
  0xcb   : > { %399 = vrot.lane.b32.xlu0 %v2738_v46, %s2533_s30 }
  0xd0   : > { %v582_v3 = vpop.permute.xlu0 %581  ;;  %v584_v4 = vpop.permute.xlu1 %583  ;;  %v2830_v7 = vld [vmem:[#allocation2 + $0x29] sm:$0x3] }
  0xd1   : > { %600 = vst.msk [vmem:[#allocation2 + $0x3a] sm:$0xff] %vm316_vm2, %v582_v3  ;;  %v2840_v9 = vld [vmem:[#allocation2 + $0x21] sm:$0xff]  ;;  %v2844_v11 = vld [vmem:[#allocation2 + $0x19] sm:$0xff] }
  0xd2   : > { %407 = vrot.lane.b32.xlu1 %v2752_v49, %s2533_s30  ;;  %409 = vrot.lane.b32.xlu2 %v2750_v48, %s2533_s30  ;;  %601 = vst.msk [vmem:[#allocation2 + $0x4a] sm:$0xff] %vm316_vm2, %v584_v4 }
  0xd3   : > { %405 = vrot.lane.b32.xlu0 %v2762_v52, %s2533_s30 }
  0xd8   : > { %v2842_v10 = vld [vmem:[#allocation2 + $0x41] sm:$0x3]  ;;  %v2854_v13 = vld [vmem:[#allocation2 + $0x39] sm:$0xff] }
  0xd9   : > { %v2864_v16 = vld [vmem:[#allocation2 + $0x51] sm:$0xff]  ;;  %v2866_v33 = vld [vmem:[#allocation2 + $0x49] sm:$0xff] }
  0xda   : > { %413 = vrot.lane.b32.xlu1 %v2767_v54, %s2533_s30  ;;  %415 = vrot.lane.b32.xlu2 %v2769_v55, %s2533_s30 }
  0xdb   : > { %411 = vrot.lane.b32.xlu0 %v2777_v58, %s2533_s30 }
  0xe2   : > { %419 = vrot.lane.b32.xlu1 %v2783_v59, %s2533_s30  ;;  %631 = vrot.lane.b32.xlu2 %v2820_v5, %s2532_s29 }
  0xe3   : > { %417 = vrot.lane.b32.xlu0 %v2785_v60, %s2533_s30 }
  0xea   : > { %629 = vrot.lane.b32.xlu1 %v2828_v6, %s2532_s29  ;;  %637 = vrot.lane.b32.xlu2 %v2830_v7, %s2532_s29 }
  0xeb   : > { %627 = vrot.lane.b32.xlu0 %v2832_v8, %s2532_s29 }
  0xf2   : > { %635 = vrot.lane.b32.xlu1 %v2840_v9, %s2532_s29  ;;  %643 = vrot.lane.b32.xlu2 %v2842_v10, %s2532_s29 }
  0xf3   : > { %633 = vrot.lane.b32.xlu0 %v2844_v11, %s2532_s29 }
  0xfa   : > { %649 = vrot.lane.b32.xlu2 %v2852_v12, %s2532_s29  ;;  %641 = vrot.lane.b32.xlu1 %v2854_v13, %s2532_s29 }
  0xfb   : > { %639 = vrot.lane.b32.xlu0 %v2856_v14, %s2532_s29 }
  0xfc   : > { %v350_v15 = vpop.permute.xlu2 %349 }
  0xfd   : > { %v385_v17 = vmax.f32 %v2727_v40, %v350_v15 }
 0x102   : > { %679 = vrot.lane.b32.xlu2 %v2820_v5, %s2533_s30  ;;  %647 = vrot.lane.b32.xlu1 %v2864_v16, %s2532_s29 }
 0x103   : > { %645 = vrot.lane.b32.xlu0 %v2866_v33, %s2532_s29 }
 0x104   : > { %v356_v34 = vpop.permute.xlu2 %355 }
 0x10a   : > { %685 = vrot.lane.b32.xlu2 %v2830_v7, %s2533_s30  ;;  %677 = vrot.lane.b32.xlu1 %v2828_v6, %s2533_s30 }
 0x10b   : > { %675 = vrot.lane.b32.xlu0 %v2832_v8, %s2533_s30 }
 0x10c   : > { %v2880_v35 = vpop.permute.xlu2 %361 }
 0x112   : > { %691 = vrot.lane.b32.xlu2 %v2842_v10, %s2533_s30  ;;  %683 = vrot.lane.b32.xlu1 %v2840_v9, %s2533_s30 }
 0x113   : > { %681 = vrot.lane.b32.xlu0 %v2844_v11, %s2533_s30 }
 0x114   : > { %v2888_v36 = vpop.permute.xlu2 %367 }
 0x11a   : > { %697 = vrot.lane.b32.xlu2 %v2852_v12, %s2533_s30  ;;  %689 = vrot.lane.b32.xlu1 %v2854_v13, %s2533_s30 }
 0x11b   : > { %687 = vrot.lane.b32.xlu0 %v2856_v14, %s2533_s30 }
 0x11c   : > { %v354_v38 = vpop.permute.xlu1 %353  ;;  %v398_v39 = vpop.permute.xlu2 %397 }
 0x11d   : > { %v352_v43 = vpop.permute.xlu0 %351  ;;  %v433_v21 = vmax.f32 %v385_v17, %v398_v39 }
 0x11e   : > { %v386_v23 = vmax.f32 %v2738_v46, %v352_v43 }
 0x11f   : > { %v458_v2 = vrot.slane %v433_v21, 1  ;;  %v495_v28 = vrot.slane %v433_v21, 2 }
 0x122   : > { %695 = vrot.lane.b32.xlu1 %v2864_v16, %s2533_s30  ;;  %811 = vrot.lane.b32.xlu2 %v278_v25, %s2530_s20 }
 0x123   : > { %693 = vrot.lane.b32.xlu0 %v2866_v33, %s2533_s30 }
 0x124   : > { %v360_v44 = vpop.permute.xlu1 %359  ;;  %v404_v53 = vpop.permute.xlu2 %403 }
 0x125   : > { %v358_v61 = vpop.permute.xlu0 %357  ;;  %v390_v4 = vmax.f32 %v2752_v49, %v360_v44 }
 0x126   : > { %v389_v43 = vmax.f32 %v2762_v52, %v358_v61 }
 0x12a   : > { %809 = vrot.lane.b32.xlu1 %v277_v20, %s2530_s20  ;;  %817 = vrot.lane.b32.xlu2 %v281_v30, %s2530_s20 }
 0x12b   : > { %807 = vrot.lane.b32.xlu0 %v276_v19, %s2530_s20  ;;  %v387_v19 = vmax.f32 %v2736_v45, %v354_v38  ;;  %v388_v45 = vmax.f32 %v2734_v42, %v356_v34 }
 0x12c   : > { %v2912_v22 = vpop.permute.xlu1 %365  ;;  %v410_v25 = vpop.permute.xlu2 %409 }
 0x12d   : > { %v2914_v63 = vpop.permute.xlu0 %363  ;;  %v436_v39 = vmax.f32 %v388_v45, %v404_v53 }
 0x12f   : > { %v463_v52 = vrot.slane %v436_v39, 1 }
 0x132   : > { %815 = vrot.lane.b32.xlu1 %v280_v26, %s2530_s20 }
 0x133   : > { %813 = vrot.lane.b32.xlu0 %v279_v24, %s2530_s20 }
 0x134   : > { %v2922_v18 = vpop.permute.xlu1 %371  ;;  %v2924_v20 = vpop.permute.xlu2 %415 }
 0x135   : > { %v2926_v27 = vpop.permute.xlu0 %369 }
 0x13a   : > { %821 = vrot.lane.b32.xlu1 %v283_v32, %s2530_s20 }
 0x13b   : > { %819 = vrot.lane.b32.xlu0 %v282_v31, %s2530_s20 }
 0x13c   : > { %v402_v24 = vpop.permute.xlu1 %401  ;;  %v2937_v26 = vpop.permute.xlu2 %631 }
 0x13d   : > { %v435_v30 = vmax.f32 %v387_v19, %v402_v24  ;;  %v400_v0 = vpop.permute.xlu0 %399 }
 0x13e   : > { %v434_v1 = vmax.f32 %v386_v23, %v400_v0 }
 0x13f   : > { %v461_v40 = vrot.slane %v435_v30, 1  ;;  %v498_v29 = vrot.slane %v435_v30, 2 }
 0x140   : > { %v459_v32 = vrot.slane %v434_v1, 1  ;;  %v496_v3 = vrot.slane %v434_v1, 2 }
 0x142   : > { %v462_v31 = vsel %vm457_vm3, %v459_v32, %v461_v40  ;;  %v460_v46 = vsel %vm457_vm3, %v458_v2, %v459_v32  ;;  %v499_v19 = vsel %vm494_vm4, %v496_v3, %v498_v29  ;;  %v497_v23 = vsel %vm494_vm4, %v495_v28, %v496_v3 }
 0x143   : > { %v487_v15 = vmax.f32 %v434_v1, %v462_v31  ;;  %v486_v38 = vmax.f32 %v433_v21, %v460_v46  ;;  %v391_v1 = vmax.f32 %v2750_v48, %v2880_v35  ;;  %v500_v29 = vrot.slane %v436_v39, 2 }
 0x144   : > { %v408_v17 = vpop.permute.xlu1 %407  ;;  %v2946_v30 = vpop.permute.xlu2 %637  ;;  %v392_v31 = vmax.f32 %v2777_v58, %v2914_v63 }
 0x145   : > { %v438_v24 = vmax.f32 %v390_v4, %v408_v17  ;;  %v406_v42 = vpop.permute.xlu0 %405  ;;  %v524_v34 = vmax.f32 %v487_v15, %v499_v19  ;;  %v523_v0 = vmax.f32 %v486_v38, %v497_v23  ;;  %v439_v28 = vmax.f32 %v391_v1, %v410_v25 }
 0x146   : > { %v437_v40 = vmax.f32 %v389_v43, %v406_v42 }
 0x147   : > { %v466_v2 = vrot.slane %v438_v24, 1  ;;  %v2949_v49 = vsub.f32 %v524_v34, %v2756_v51  ;;  %v2952_v44 = vsub.f32 %v523_v0, %v2724_v37  ;;  %v503_v53 = vrot.slane %v438_v24, 2 }
 0x148   : > { %v464_v61 = vrot.slane %v437_v40, 1  ;;  %v501_v21 = vrot.slane %v437_v40, 2  ;;  %v393_v37 = vmax.f32 %v2767_v54, %v2912_v22  ;;  %v468_v58 = vrot.slane %v439_v28, 1 }
 0x149   : > { %849 = vrot.lane.b32.xlu0 %v2949_v49, %s2530_s20  ;;  %847 = vrot.lane.b32.xlu2 %v2952_v44, %s2530_s20  ;;  %v394_v24 = vmax.f32 %v2769_v55, %v2888_v36  ;;  %v505_v42 = vrot.slane %v439_v28, 2 }
 0x14a   : > { %v467_v51 = vsel %vm457_vm3, %v464_v61, %v466_v2  ;;  %v465_v32 = vsel %vm457_vm3, %v463_v52, %v464_v61  ;;  %v504_v4 = vsel %vm494_vm4, %v501_v21, %v503_v53  ;;  %v502_v15 = vsel %vm494_vm4, %v500_v29, %v501_v21 }
 0x14b   : > { %v489_v3 = vmax.f32 %v437_v40, %v467_v51  ;;  %v488_v45 = vmax.f32 %v436_v39, %v465_v32  ;;  %v442_v2 = vmax.f32 %v394_v24, %v2924_v20  ;;  %v395_v52 = vmax.f32 %v2785_v60, %v2926_v27 }
 0x14c   : > { %v414_v46 = vpop.permute.xlu1 %413  ;;  %v2968_v23 = vpop.permute.xlu2 %643 }
 0x14d   : > { %v441_v48 = vmax.f32 %v393_v37, %v414_v46  ;;  %v412_v35 = vpop.permute.xlu0 %411  ;;  %v526_v38 = vmax.f32 %v489_v3, %v504_v4  ;;  %v525_v43 = vmax.f32 %v488_v45, %v502_v15  ;;  %v473_v20 = vrot.slane %v442_v2, 1 }
 0x14e   : > { %v440_v17 = vmax.f32 %v392_v31, %v412_v35  ;;  %v510_v45 = vrot.slane %v442_v2, 2 }
 0x14f   : > { %v471_v19 = vrot.slane %v441_v48, 1  ;;  %v2971_v54 = vsub.f32 %v526_v38, %v2732_v41  ;;  %v2974_v22 = vsub.f32 %v525_v43, %v2754_v50  ;;  %v508_v25 = vrot.slane %v441_v48, 2 }
 0x150   : > { %v469_v63 = vrot.slane %v440_v17, 1  ;;  %v506_v39 = vrot.slane %v440_v17, 2  ;;  %v396_v50 = vmax.f32 %v2783_v59, %v2922_v18 }
 0x151   : > { %853 = vrot.lane.b32.xlu2 %v2971_v54, %s2530_s20  ;;  %851 = vrot.lane.b32.xlu1 %v2974_v22, %s2530_s20 }
 0x152   : > { %v472_v41 = vsel %vm457_vm3, %v469_v63, %v471_v19  ;;  %v470_v34 = vsel %vm457_vm3, %v468_v58, %v469_v63  ;;  %v509_v61 = vsel %vm494_vm4, %v506_v39, %v508_v25  ;;  %v507_v55 = vsel %vm494_vm4, %v505_v42, %v506_v39 }
 0x153   : > { %v491_v0 = vmax.f32 %v440_v17, %v472_v41  ;;  %v490_v40 = vmax.f32 %v439_v28, %v470_v34 }
 0x154   : > { %v420_v53 = vpop.permute.xlu1 %419  ;;  %v2997_v3 = vpop.permute.xlu2 %649 }
 0x155   : > { %v444_v36 = vmax.f32 %v396_v50, %v420_v53  ;;  %v418_v21 = vpop.permute.xlu0 %417  ;;  %v528_v1 = vmax.f32 %v491_v0, %v509_v61  ;;  %v527_v29 = vmax.f32 %v490_v40, %v507_v55 }
 0x156   : > { %v443_v51 = vmax.f32 %v395_v52, %v418_v21 }
 0x157   : > { %v476_v32 = vrot.slane %v444_v36, 1  ;;  %v2992_v59 = vsub.f32 %v528_v1, %v2771_v56  ;;  %v2995_v18 = vsub.f32 %v527_v29, %v2773_v57  ;;  %v513_v37 = vrot.slane %v444_v36, 2 }
 0x158   : > { %v474_v60 = vrot.slane %v443_v51, 1  ;;  %v511_v27 = vrot.slane %v443_v51, 2  ;;  %v671_v29 = vmax.f32 %v2842_v10, %v2968_v23 }
 0x159   : > { %857 = vrot.lane.b32.xlu1 %v2992_v59, %s2530_s20  ;;  %855 = vrot.lane.b32.xlu0 %v2995_v18, %s2530_s20 }
 0x15a   : > { %v477_v28 = vsel %vm457_vm3, %v474_v60, %v476_v32  ;;  %v475_v56 = vsel %vm457_vm3, %v473_v20, %v474_v60  ;;  %v514_v4 = vsel %vm494_vm4, %v511_v27, %v513_v37  ;;  %v512_v15 = vsel %vm494_vm4, %v510_v45, %v511_v27 }
 0x15b   : > { %v493_v31 = vmax.f32 %v443_v51, %v477_v28  ;;  %v492_v57 = vmax.f32 %v442_v2, %v475_v56  ;;  %v665_v27 = vmax.f32 %v2820_v5, %v2937_v26 }
 0x15c   : > { %v630_v46 = vpop.permute.xlu1 %629  ;;  %v680_v19 = vpop.permute.xlu2 %679 }
 0x15d   : > { %v628_v48 = vpop.permute.xlu0 %627  ;;  %v530_v35 = vmax.f32 %v493_v31, %v514_v4  ;;  %v529_v38 = vmax.f32 %v492_v57, %v512_v15  ;;  %v664_v32 = vmax.f32 %v2828_v6, %v630_v46  ;;  %v713_v57 = vmax.f32 %v665_v27, %v680_v19 }
 0x15f   : > { %v3008_v43 = vsub.f32 %v530_v35, %v2787_v62  ;;  %v3011_v17 = vsub.f32 %v529_v38, %v2748_v47  ;;  %v738_v26 = vrot.slane %v713_v57, 1 }
 0x161   : > { %861 = vrot.lane.b32.xlu0 %v3008_v43, %s2530_s20  ;;  %859 = vrot.lane.b32.xlu2 %v3011_v17, %s2530_s20 }
 0x164   : > { %v636_v58 = vpop.permute.xlu1 %635  ;;  %v686_v39 = vpop.permute.xlu2 %685 }
 0x165   : > { %v634_v25 = vpop.permute.xlu0 %633  ;;  %v667_v0 = vmax.f32 %v2840_v9, %v636_v58 }
 0x166   : > { %v666_v40 = vmax.f32 %v2844_v11, %v634_v25  ;;  %v663_v11 = vmax.f32 %v2832_v8, %v628_v48 }
 0x16c   : > { %v642_v63 = vpop.permute.xlu1 %641  ;;  %v692_v62 = vpop.permute.xlu2 %691 }
 0x16d   : > { %v640_v24 = vpop.permute.xlu0 %639  ;;  %v719_v20 = vmax.f32 %v671_v29, %v692_v62  ;;  %v670_v37 = vmax.f32 %v2854_v13, %v642_v63 }
 0x16e   : > { %v669_v38 = vmax.f32 %v2856_v14, %v640_v24 }
 0x16f   : > { %v748_v46 = vrot.slane %v719_v20, 1  ;;  %v784_v48 = vrot.slane %v719_v20, 2  ;;  %v674_v20 = vmax.f32 %v2852_v12, %v2997_v3 }
 0x174   : > { %v3017_v42 = vpop.permute.xlu1 %647  ;;  %v3021_v50 = vpop.permute.xlu2 %697 }
 0x175   : > { %v3019_v41 = vpop.permute.xlu0 %645 }
 0x17c   : > { %v678_v34 = vpop.permute.xlu1 %677  ;;  %v812_v51 = vpop.permute.xlu2 %811 }
 0x17d   : > { %v676_v47 = vpop.permute.xlu0 %675  ;;  %v712_v45 = vmax.f32 %v664_v32, %v678_v34  ;;  %v673_v32 = vmax.f32 %v2864_v16, %v3017_v42 }
 0x17e   : > { %v711_v6 = vmax.f32 %v663_v11, %v676_v47 }
 0x17f   : > { %v736_v13 = vrot.slane %v712_v45, 1 }
 0x180   : > { %v735_v35 = vrot.slane %v711_v6, 1  ;;  %v771_v14 = vrot.slane %v711_v6, 2 }
 0x181   : > { %v739_v47 = vsel %vm457_vm3, %v736_v13, %v738_v26 }
 0x182   : > { %v764_v24 = vmax.f32 %v712_v45, %v739_v47 }
 0x184   : > { %v684_v2 = vpop.permute.xlu1 %683  ;;  %v818_v25 = vpop.permute.xlu2 %817 }
 0x185   : > { %v3025_v52 = vmax.f32 %v667_v0, %v684_v2  ;;  %v682_v53 = vpop.permute.xlu0 %681  ;;  %v668_v0 = vmax.f32 %v2830_v7, %v2946_v30  ;;  %v737_v2 = vsel %vm457_vm3, %v735_v35, %v736_v13 }
 0x186   : > { %v714_v61 = vmax.f32 %v666_v40, %v682_v53  ;;  %v772_v53 = vrot.slane %v712_v45, 2 }
 0x187   : > { %v741_v55 = vrot.slane %v3025_v52, 1  ;;  %v777_v36 = vrot.slane %v3025_v52, 2 }
 0x188   : > { %v740_v21 = vrot.slane %v714_v61, 1  ;;  %v776_v1 = vrot.slane %v714_v61, 2 }
 0x18a   : > { %v742_v9 = vsel %vm457_vm3, %v740_v21, %v741_v55  ;;  %v778_v10 = vsel %vm494_vm4, %v776_v1, %v777_v36  ;;  %v716_v21 = vmax.f32 %v668_v0, %v686_v39  ;;  %v774_v1 = vrot.slane %v713_v57, 2 }
 0x18b   : > { %v765_v60 = vmax.f32 %v714_v61, %v742_v9  ;;  %v672_v9 = vmax.f32 %v2866_v33, %v3019_v41  ;;  %v773_v39 = vsel %vm494_vm4, %v771_v14, %v772_v53  ;;  %v722_v33 = vmax.f32 %v674_v20, %v3021_v50 }
 0x18c   : > { %v690_v28 = vpop.permute.xlu1 %689  ;;  %v775_v7 = vsel %vm494_vm4, %v772_v53, %v774_v1  ;;  %v743_v30 = vrot.slane %v716_v21, 1 }
 0x18d   : > { %v718_v23 = vmax.f32 %v670_v37, %v690_v28  ;;  %v688_v56 = vpop.permute.xlu0 %687  ;;  %v801_v31 = vmax.f32 %v765_v60, %v778_v10  ;;  %v800_v11 = vmax.f32 %v764_v24, %v775_v7  ;;  %v753_v57 = vrot.slane %v722_v33, 1 }
 0x18e   : > { %v717_v63 = vmax.f32 %v669_v38, %v688_v56  ;;  %v744_v42 = vsel %vm457_vm3, %v741_v55, %v743_v30  ;;  %v779_v56 = vrot.slane %v716_v21, 2 }
 0x18f   : > { %v746_v8 = vrot.slane %v718_v23, 1  ;;  %v782_v4 = vrot.slane %v718_v23, 2  ;;  %v3042_v15 = vsub.f32 %v801_v31, %v812_v51  ;;  %v763_v51 = vmax.f32 %v711_v6, %v737_v2 }
 0x190   : > { %v745_v29 = vrot.slane %v717_v63, 1  ;;  %v781_v41 = vrot.slane %v717_v63, 2 }
 0x191   : > { %4129 = vst [vmem:[#allocation9_spill] sm:$0xff] %v3042_v15  ;;  %1265 = vrot.lane.b32.xlu0 %v3042_v15, %s2530_s20  ;;  %v749_v5 = vsel %vm457_vm3, %v746_v8, %v748_v46  ;;  %v785_v19 = vsel %vm494_vm4, %v782_v4, %v784_v48  ;;  %v799_v27 = vmax.f32 %v763_v51, %v773_v39 }
 0x192   : > { %v768_v58 = vmax.f32 %v718_v23, %v749_v5  ;;  %v747_v45 = vsel %vm457_vm3, %v745_v29, %v746_v8  ;;  %v766_v23 = vmax.f32 %v3025_v52, %v744_v42  ;;  %v783_v55 = vsel %vm494_vm4, %v781_v41, %v782_v4 }
 0x193   : > { %v767_v12 = vmax.f32 %v717_v63, %v747_v45  ;;  %v780_v8 = vsel %vm494_vm4, %v777_v36, %v779_v56  ;;  %v789_v36 = vrot.slane %v722_v33, 2 }
 0x194   : > { %v696_v62 = vpop.permute.xlu1 %695  ;;  %v804_v34 = vmax.f32 %v768_v58, %v785_v19  ;;  %v802_v48 = vmax.f32 %v766_v23, %v780_v8 }
 0x195   : > { %v694_v40 = vpop.permute.xlu0 %693  ;;  %v721_v37 = vmax.f32 %v673_v32, %v696_v62  ;;  %v803_v50 = vmax.f32 %v767_v12, %v783_v55 }
 0x196   : > { %v3053_v61 = vsub.f32 %v804_v34, %v818_v25  ;;  %v720_v28 = vmax.f32 %v672_v9, %v694_v40 }
 0x197   : > { %v751_v3 = vrot.slane %v721_v37, 1  ;;  %v787_v58 = vrot.slane %v721_v37, 2 }
 0x198   : > { %4130 = vst [vmem:[#allocation10_spill] sm:$0xff] %v3053_v61  ;;  %v750_v31 = vrot.slane %v720_v28, 1  ;;  %v786_v4 = vrot.slane %v720_v28, 2 }
 0x199   : > { %1271 = vrot.lane.b32.xlu0 %v3053_v61, %s2530_s20  ;;  %v754_v35 = vsel %vm457_vm3, %v751_v3, %v753_v57  ;;  %v790_v63 = vsel %vm494_vm4, %v787_v58, %v789_v36 }
 0x19a   : > { %v752_v38 = vsel %vm457_vm3, %v750_v31, %v751_v3  ;;  %v770_v52 = vmax.f32 %v721_v37, %v754_v35  ;;  %v788_v47 = vsel %vm494_vm4, %v786_v4, %v787_v58 }
 0x19b   : > { %v769_v19 = vmax.f32 %v720_v28, %v752_v38 }
 0x19c   : > { %v810_v60 = vpop.permute.xlu1 %809  ;;  %v806_v34 = vmax.f32 %v770_v52, %v790_v63 }
 0x19d   : > { %v3066_v10 = vsub.f32 %v800_v11, %v810_v60  ;;  %v808_v16 = vpop.permute.xlu0 %807  ;;  %v805_v40 = vmax.f32 %v769_v19, %v788_v47 }
 0x19e   : > { %v3072_v6 = vsub.f32 %v799_v27, %v808_v16 }
 0x19f   : > { %4131 = vst [vmem:[#allocation11_spill] sm:$0xff] %v3066_v10  ;;  %1263 = vrot.lane.b32.xlu2 %v3066_v10, %s2530_s20 }
 0x1a0   : > { %1261 = vrot.lane.b32.xlu1 %v3072_v6, %s2530_s20 }
 0x1a3   : > { %v848_v46 = vpop.permute.xlu2 %847 }
 0x1a4   : > { %871 = vst.msk [vmem:[#allocation2 + $0x2] sm:$0xff] %vm316_vm2, %v848_v46  ;;  %v816_v13 = vpop.permute.xlu1 %815 }
 0x1a5   : > { %v3085_v5 = vsub.f32 %v803_v50, %v816_v13  ;;  %v814_v26 = vpop.permute.xlu0 %813 }
 0x1a6   : > { %v3088_v25 = vsub.f32 %v802_v48, %v814_v26 }
 0x1a7   : > { %4132 = vst [vmem:[#allocation12_spill] sm:$0xff] %v3085_v5  ;;  %1269 = vrot.lane.b32.xlu2 %v3085_v5, %s2530_s20 }
 0x1a8   : > { %1267 = vrot.lane.b32.xlu1 %v3088_v25, %s2530_s20 }
 0x1ab   : > { %v854_v62 = vpop.permute.xlu2 %853  ;;  %v3105_v14 = vld [vmem:[#allocation2] sm:$0xff] }
 0x1ac   : > { %874 = vst.msk [vmem:[#allocation2 + $0x22] sm:$0xff] %vm316_vm2, %v854_v62  ;;  %v822_v0 = vpop.permute.xlu1 %821 }
 0x1ad   : > { %v3097_v2 = vsub.f32 %v806_v34, %v822_v0  ;;  %v820_v53 = vpop.permute.xlu0 %819  ;;  %4135 = vst [vmem:[#allocation15_spill] sm:$0xff] %v3105_v14 }
 0x1ae   : > { %v3099_v21 = vsub.f32 %v805_v40, %v820_v53 }
 0x1af   : > { %4133 = vst [vmem:[#allocation13_spill] sm:$0xff] %v3097_v2  ;;  %1275 = vrot.lane.b32.xlu2 %v3097_v2, %s2530_s20 }
 0x1b0   : > { %4134 = vst [vmem:[#allocation14_spill] sm:$0xff] %v3099_v21  ;;  %1273 = vrot.lane.b32.xlu1 %v3099_v21, %s2530_s20 }
 0x1b3   : > { %v3127_v39 = vld [vmem:[#allocation2 + $0x28] sm:$0xf] }
 0x1b4   : > { %4136 = vst [vmem:[#allocation16_spill] sm:$0xff] %v3127_v39 }
 0x1b8   : > { %903 = vrot.lane.b32.xlu1 %v3105_v14, %s2532_s29 }
 0x1bb   : > { %v860_v24 = vpop.permute.xlu2 %859  ;;  %v850_v1 = vpop.permute.xlu0 %849 }
 0x1bc   : > { %877 = vst.msk [vmem:[#allocation2 + $0x4a] sm:$0xff] %vm316_vm2, %v860_v24 }
 0x1bd   : > { %872 = vst.msk [vmem:[#allocation2 + $0xa] sm:$0xff] %vm316_vm2, %v850_v1 }
 0x1c3   : > { %v852_v29 = vpop.permute.xlu1 %851  ;;  %v3151_v16 = vld [vmem:[#allocation2 + $0x48] sm:$0xff] }
 0x1c4   : > { %873 = vst.msk [vmem:[#allocation2 + $0x1a] sm:$0xff] %vm316_vm2, %v852_v29  ;;  %v3112_v51 = vld [vmem:[#allocation2 + $0x10] sm:$0xf]  ;;  %v3114_v32 = vld [vmem:[#allocation2 + $0x8] sm:$0xff] }
 0x1c5   : > { %907 = vrot.lane.b32.xlu0 %v3112_v51, %s2532_s29  ;;  %905 = vrot.lane.b32.xlu2 %v3114_v32, %s2532_s29 }
 0x1cb   : > { %v858_v7 = vpop.permute.xlu1 %857  ;;  %v856_v30 = vpop.permute.xlu0 %855  ;;  %v3120_v9 = vld [vmem:[#allocation2 + $0x18] sm:$0xff]  ;;  %v3122_v11 = vld [vmem:[#allocation2 + $0x20] sm:$0xff] }
 0x1cc   : > { %876 = vst.msk [vmem:[#allocation2 + $0x3a] sm:$0xff] %vm316_vm2, %v858_v7  ;;  %909 = vrot.lane.b32.xlu1 %v3120_v9, %s2532_s29 }
 0x1cd   : > { %875 = vst.msk [vmem:[#allocation2 + $0x32] sm:$0xff] %vm316_vm2, %v856_v30  ;;  %913 = vrot.lane.b32.xlu0 %v3127_v39, %s2532_s29  ;;  %911 = vrot.lane.b32.xlu2 %v3122_v11, %s2532_s29 }
 0x1d3   : > { %v862_v20 = vpop.permute.xlu0 %861  ;;  %v3134_v37 = vld [vmem:[#allocation2 + $0x40] sm:$0xf] }
 0x1d4   : > { %4137 = vst [vmem:[#allocation17_spill] sm:$0xff] %v3134_v37  ;;  %v3137_v60 = vld [vmem:[#allocation2 + $0x38] sm:$0xff]  ;;  %v3139_v27 = vld [vmem:[#allocation2 + $0x30] sm:$0xff] }
 0x1d5   : > { %878 = vst.msk [vmem:[#allocation2 + $0x52] sm:$0xff] %vm316_vm2, %v862_v20  ;;  %919 = vrot.lane.b32.xlu0 %v3134_v37, %s2532_s29  ;;  %917 = vrot.lane.b32.xlu2 %v3137_v60, %s2532_s29 }
 0x1d6   : > { %4138 = vst [vmem:[#allocation18_spill] sm:$0xff] %v3137_v60  ;;  %915 = vrot.lane.b32.xlu1 %v3139_v27, %s2532_s29 }
 0x1d7   : > { %4139 = vst [vmem:[#allocation19_spill] sm:$0xff] %v3139_v27 }
 0x1dc   : > { %v3147_v45 = vld [vmem:[#allocation2 + $0x58] sm:$0xf]  ;;  %v3149_v28 = vld [vmem:[#allocation2 + $0x50] sm:$0xff] }
 0x1dd   : > { %925 = vrot.lane.b32.xlu0 %v3147_v45, %s2532_s29  ;;  %923 = vrot.lane.b32.xlu2 %v3149_v28, %s2532_s29 }
 0x1de   : > { %921 = vrot.lane.b32.xlu1 %v3151_v16, %s2532_s29 }
 0x1e5   : > { %955 = vrot.lane.b32.xlu0 %v3112_v51, %s2533_s30  ;;  %953 = vrot.lane.b32.xlu2 %v3114_v32, %s2533_s30 }
 0x1e6   : > { %951 = vrot.lane.b32.xlu1 %v3105_v14, %s2533_s30 }
 0x1ed   : > { %961 = vrot.lane.b32.xlu0 %v3127_v39, %s2533_s30  ;;  %959 = vrot.lane.b32.xlu2 %v3122_v11, %s2533_s30 }
 0x1ee   : > { %957 = vrot.lane.b32.xlu1 %v3120_v9, %s2533_s30 }
 0x1f5   : > { %967 = vrot.lane.b32.xlu0 %v3134_v37, %s2533_s30  ;;  %965 = vrot.lane.b32.xlu2 %v3137_v60, %s2533_s30 }
 0x1f6   : > { %963 = vrot.lane.b32.xlu1 %v3139_v27, %s2533_s30 }
 0x1f9   : > { %v1264_v42 = vpop.permute.xlu2 %1263 }
 0x1fa   : > { %1286 = vst.msk [vmem:[#allocation2 + $0xa] sm:$0xff] %vm316_vm2, %v1264_v42 }
 0x1fd   : > { %973 = vrot.lane.b32.xlu0 %v3147_v45, %s2533_s30  ;;  %971 = vrot.lane.b32.xlu2 %v3149_v28, %s2533_s30 }
 0x1fe   : > { %969 = vrot.lane.b32.xlu1 %v3151_v16, %s2533_s30 }
 0x201   : > { %v1270_v33 = vpop.permute.xlu2 %1269  ;;  %v3259_v58 = vld [vmem:[#allocation2 + $0x10] sm:$0xf] }
 0x202   : > { %1289 = vst.msk [vmem:[#allocation2 + $0x32] sm:$0xff] %vm316_vm2, %v1270_v33 }
 0x203   : > { %v1266_v41 = vpop.permute.xlu0 %1265 }
 0x204   : > { %1287 = vst.msk [vmem:[#allocation2 + $0x1a] sm:$0xff] %vm316_vm2, %v1266_v41 }
 0x205   : > { %1003 = vrot.lane.b32.xlu0 %v3112_v51, %s2534_s3  ;;  %1001 = vrot.lane.b32.xlu2 %v3114_v32, %s2534_s3 }
 0x206   : > { %999 = vrot.lane.b32.xlu1 %v3105_v14, %s2534_s3 }
 0x209   : > { %v1276_v12 = vpop.permute.xlu2 %1275  ;;  %v3293_v53 = vld [vmem:[#allocation2 + $0x30] sm:$0xff] }
 0x20a   : > { %1292 = vst.msk [vmem:[#allocation2 + $0x52] sm:$0xff] %vm316_vm2, %v1276_v12 }
 0x20b   : > { %v1272_v3 = vpop.permute.xlu0 %1271  ;;  %v3277_v62 = vld [vmem:[#allocation2 + $0x18] sm:$0xff] }
 0x20c   : > { %1290 = vst.msk [vmem:[#allocation2 + $0x3a] sm:$0xff] %vm316_vm2, %v1272_v3 }
 0x20d   : > { %1009 = vrot.lane.b32.xlu0 %v3127_v39, %s2534_s3  ;;  %1007 = vrot.lane.b32.xlu2 %v3122_v11, %s2534_s3 }
 0x20e   : > { %1005 = vrot.lane.b32.xlu1 %v3120_v9, %s2534_s3 }
 0x211   : > { %v3311_v42 = vld [vmem:[#allocation2 + $0x58] sm:$0xf] }
 0x212   : > { %v1262_v23 = vpop.permute.xlu1 %1261 }
 0x213   : > { %1285 = vst.msk [vmem:[#allocation2 + $0x2] sm:$0xff] %vm316_vm2, %v1262_v23  ;;  %v3295_v24 = vld [vmem:[#allocation2 + $0x40] sm:$0xf]  ;;  %v3301_v1 = vld [vmem:[#allocation2 + $0x38] sm:$0xff] }
 0x215   : > { %1015 = vrot.lane.b32.xlu0 %v3134_v37, %s2534_s3  ;;  %1013 = vrot.lane.b32.xlu2 %v3137_v60, %s2534_s3 }
 0x216   : > { %1011 = vrot.lane.b32.xlu1 %v3139_v27, %s2534_s3 }
 0x21a   : > { %v1268_v56 = vpop.permute.xlu1 %1267  ;;  %v3257_v38 = vld [vmem:[#allocation2] sm:$0xff]  ;;  %v3261_v4 = vld [vmem:[#allocation2 + $0x8] sm:$0xff] }
 0x21b   : > { %1288 = vst.msk [vmem:[#allocation2 + $0x22] sm:$0xff] %vm316_vm2, %v1268_v56 }
 0x21d   : > { %1021 = vrot.lane.b32.xlu0 %v3147_v45, %s2534_s3  ;;  %1019 = vrot.lane.b32.xlu2 %v3149_v28, %s2534_s3 }
 0x21e   : > { %1017 = vrot.lane.b32.xlu1 %v3151_v16, %s2534_s3 }
 0x21f   : > { %v3214_v31 = vpop.permute.xlu2 %905 }
 0x220   : > { %v940_v10 = vmax.f32 %v3114_v32, %v3214_v31 }
 0x222   : > { %v1274_v57 = vpop.permute.xlu1 %1273  ;;  %v3275_v63 = vld [vmem:[#allocation2 + $0x28] sm:$0xf]  ;;  %v3281_v34 = vld [vmem:[#allocation2 + $0x20] sm:$0xff] }
 0x223   : > { %1291 = vst.msk [vmem:[#allocation2 + $0x4a] sm:$0xff] %vm316_vm2, %v1274_v57 }
 0x225   : > { %1051 = vrot.lane.b32.xlu0 %v3112_v51, %s2535_s4  ;;  %1049 = vrot.lane.b32.xlu2 %v3114_v32, %s2535_s4 }
 0x226   : > { %1047 = vrot.lane.b32.xlu1 %v3105_v14, %s2535_s4 }
 0x227   : > { %v3223_v55 = vpop.permute.xlu2 %911 }
 0x22a   : > { %v3237_v50 = vpop.permute.xlu1 %903  ;;  %v3309_v20 = vld [vmem:[#allocation2 + $0x48] sm:$0xff]  ;;  %v3317_v33 = vld [vmem:[#allocation2 + $0x50] sm:$0xff] }
 0x22b   : > { %4141 = vst [vmem:[#allocation21_spill] sm:$0xff] %v3237_v50 }
 0x22d   : > { %1057 = vrot.lane.b32.xlu0 %v3127_v39, %s2535_s4  ;;  %1055 = vrot.lane.b32.xlu2 %v3122_v11, %s2535_s4 }
 0x22e   : > { %1053 = vrot.lane.b32.xlu1 %v3120_v9, %s2535_s4 }
 0x22f   : > { %v3231_v46 = vpop.permute.xlu2 %917 }
 0x230   : > { %4140 = vst [vmem:[#allocation20_spill] sm:$0xff] %v3231_v46 }
 0x235   : > { %1063 = vrot.lane.b32.xlu0 %v3134_v37, %s2535_s4  ;;  %1061 = vrot.lane.b32.xlu2 %v3137_v60, %s2535_s4 }
 0x236   : > { %1059 = vrot.lane.b32.xlu1 %v3139_v27, %s2535_s4 }
 0x237   : > { %v3241_v8 = vpop.permute.xlu2 %923  ;;  %v3243_v13 = vpop.permute.xlu0 %907 }
 0x23d   : > { %1069 = vrot.lane.b32.xlu0 %v3147_v45, %s2535_s4  ;;  %1067 = vrot.lane.b32.xlu2 %v3149_v28, %s2535_s4 }
 0x23e   : > { %1065 = vrot.lane.b32.xlu1 %v3151_v16, %s2535_s4  ;;  %v3251_v48 = vpop.permute.xlu1 %909 }
 0x23f   : > { %v3253_v35 = vpop.permute.xlu2 %953  ;;  %v3255_v26 = vpop.permute.xlu0 %913 }
 0x240   : > { %4142 = vst [vmem:[#allocation22_spill] sm:$0xff] %v3255_v26 }
 0x245   : > { %1317 = vrot.lane.b32.xlu0 %v3257_v38, %s2532_s29  ;;  %1321 = vrot.lane.b32.xlu2 %v3259_v58, %s2532_s29 }
 0x246   : > { %1319 = vrot.lane.b32.xlu1 %v3261_v4, %s2532_s29 }
 0x247   : > { %v3269_v52 = vpop.permute.xlu2 %959  ;;  %v3271_v36 = vpop.permute.xlu0 %919 }
 0x248   : > { %4143 = vst [vmem:[#allocation23_spill] sm:$0xff] %v3271_v36  ;;  %v3273_v19 = vpop.permute.xlu1 %915 }
 0x249   : > { %4144 = vst [vmem:[#allocation24_spill] sm:$0xff] %v3273_v19 }
 0x24d   : > { %1327 = vrot.lane.b32.xlu2 %v3275_v63, %s2532_s29  ;;  %1323 = vrot.lane.b32.xlu0 %v3277_v62, %s2532_s29 }
 0x24e   : > { %1325 = vrot.lane.b32.xlu1 %v3281_v34, %s2532_s29 }
 0x24f   : > { %v3287_v47 = vpop.permute.xlu2 %965  ;;  %v3289_v0 = vpop.permute.xlu0 %925 }
 0x250   : > { %4145 = vst [vmem:[#allocation25_spill] sm:$0xff] %v3287_v47  ;;  %v3291_v40 = vpop.permute.xlu1 %921 }
 0x255   : > { %1329 = vrot.lane.b32.xlu0 %v3293_v53, %s2532_s29  ;;  %1333 = vrot.lane.b32.xlu2 %v3295_v24, %s2532_s29 }
 0x256   : > { %1331 = vrot.lane.b32.xlu1 %v3301_v1, %s2532_s29 }
 0x257   : > { %v3305_v29 = vpop.permute.xlu2 %971  ;;  %v956_v7 = vpop.permute.xlu0 %955 }
 0x258   : > { %v3307_v30 = vpop.permute.xlu1 %951 }
 0x259   : > { %4146 = vst [vmem:[#allocation26_spill] sm:$0xff] %v3307_v30 }
 0x25d   : > { %1335 = vrot.lane.b32.xlu0 %v3309_v20, %s2532_s29  ;;  %1339 = vrot.lane.b32.xlu2 %v3311_v42, %s2532_s29 }
 0x25e   : > { %1337 = vrot.lane.b32.xlu1 %v3317_v33, %s2532_s29 }
 0x25f   : > { %v1002_v41 = vpop.permute.xlu2 %1001  ;;  %v3321_v12 = vpop.permute.xlu0 %961 }
 0x260   : > { %4147 = vst [vmem:[#allocation27_spill] sm:$0xff] %v3321_v12  ;;  %v958_v3 = vpop.permute.xlu1 %957 }
 0x265   : > { %1365 = vrot.lane.b32.xlu0 %v3257_v38, %s2533_s30  ;;  %1369 = vrot.lane.b32.xlu2 %v3259_v58, %s2533_s30 }
 0x266   : > { %1367 = vrot.lane.b32.xlu1 %v3261_v4, %s2533_s30 }
 0x267   : > { %v3329_v23 = vpop.permute.xlu2 %1007  ;;  %v3331_v56 = vpop.permute.xlu0 %967 }
 0x268   : > { %4148 = vst [vmem:[#allocation28_spill] sm:$0xff] %v3331_v56  ;;  %v3333_v57 = vpop.permute.xlu1 %963 }
 0x269   : > { %4149 = vst [vmem:[#allocation29_spill] sm:$0xff] %v3333_v57 }
 0x26d   : > { %1371 = vrot.lane.b32.xlu0 %v3277_v62, %s2533_s30  ;;  %1375 = vrot.lane.b32.xlu2 %v3275_v63, %s2533_s30 }
 0x26e   : > { %1373 = vrot.lane.b32.xlu1 %v3281_v34, %s2533_s30 }
 0x26f   : > { %v3341_v37 = vpop.permute.xlu2 %1013  ;;  %v3343_v36 = vpop.permute.xlu0 %973 }
 0x270   : > { %4150 = vst [vmem:[#allocation30_spill] sm:$0xff] %v3341_v37  ;;  %v3345_v47 = vpop.permute.xlu1 %969 }
 0x275   : > { %1377 = vrot.lane.b32.xlu0 %v3293_v53, %s2533_s30  ;;  %1381 = vrot.lane.b32.xlu2 %v3295_v24, %s2533_s30 }
 0x276   : > { %1379 = vrot.lane.b32.xlu1 %v3301_v1, %s2533_s30 }
 0x277   : > { %v3353_v56 = vpop.permute.xlu2 %1019  ;;  %v1004_v57 = vpop.permute.xlu0 %1003 }
 0x278   : > { %v3355_v60 = vpop.permute.xlu1 %999 }
 0x279   : > { %4151 = vst [vmem:[#allocation31_spill] sm:$0xff] %v3355_v60 }
 0x27d   : > { %1383 = vrot.lane.b32.xlu0 %v3309_v20, %s2533_s30  ;;  %1387 = vrot.lane.b32.xlu2 %v3311_v42, %s2533_s30 }
 0x27e   : > { %1385 = vrot.lane.b32.xlu1 %v3317_v33, %s2533_s30 }
 0x27f   : > { %v1050_v37 = vpop.permute.xlu2 %1049  ;;  %v3363_v46 = vpop.permute.xlu0 %1009 }
 0x280   : > { %4152 = vst [vmem:[#allocation32_spill] sm:$0xff] %v3363_v46  ;;  %v1006_v27 = vpop.permute.xlu1 %1005 }
 0x285   : > { %1413 = vrot.lane.b32.xlu0 %v3257_v38, %s2534_s3  ;;  %1417 = vrot.lane.b32.xlu2 %v3259_v58, %s2534_s3 }
 0x286   : > { %1415 = vrot.lane.b32.xlu1 %v3261_v4, %s2534_s3 }
 0x287   : > { %v1056_v19 = vpop.permute.xlu2 %1055  ;;  %v3371_v61 = vpop.permute.xlu0 %1015 }
 0x288   : > { %4153 = vst [vmem:[#allocation33_spill] sm:$0xff] %v3371_v61  ;;  %v3373_v2 = vpop.permute.xlu1 %1011  ;;  %v941_v61 = vmax.f32 %v3112_v51, %v3243_v13 }
 0x289   : > { %4154 = vst [vmem:[#allocation34_spill] sm:$0xff] %v3373_v2  ;;  %v988_v2 = vmax.f32 %v940_v10, %v3253_v35  ;;  %v942_v35 = vmax.f32 %v3120_v9, %v3251_v48 }
 0x28a   : > { %v989_v12 = vmax.f32 %v941_v61, %v956_v7  ;;  %v943_v61 = vmax.f32 %v3122_v11, %v3223_v55 }
 0x28b   : > { %v1036_v39 = vmax.f32 %v988_v2, %v1002_v41  ;;  %v990_v41 = vmax.f32 %v942_v35, %v958_v3 }
 0x28d   : > { %1419 = vrot.lane.b32.xlu0 %v3277_v62, %s2534_s3  ;;  %1423 = vrot.lane.b32.xlu2 %v3275_v63, %s2534_s3  ;;  %v3396_v26 = vmax.f32 %v1036_v39, %v1050_v37  ;;  %v991_v37 = vmax.f32 %v943_v61, %v3269_v52  ;;  %v1038_v48 = vmax.f32 %v990_v41, %v1006_v27 }
 0x28e   : > { %1421 = vrot.lane.b32.xlu1 %v3281_v34, %s2534_s3 }
 0x28f   : > { %v3381_v15 = vpop.permute.xlu2 %1061  ;;  %v3383_v5 = vpop.permute.xlu0 %1021  ;;  %4156 = vst [vmem:[#allocation36_spill] sm:$0xff] %v3396_v26  ;;  %v4112_v2 = vrot.slane %v3396_v26, 1  ;;  %v1039_v11 = vmax.f32 %v991_v37, %v3329_v23  ;;  %v4114_v23 = vrot.slane %v3396_v26, 3  ;;  %v4113_v27 = vrot.slane %v3396_v26, 4 }
 0x290   : > { %4155 = vst [vmem:[#allocation35_spill] sm:$0xff] %v3381_v15  ;;  %v3387_v46 = vpop.permute.xlu1 %1017  ;;  %v1037_v15 = vmax.f32 %v989_v12, %v1004_v57 }
 0x291   : > { %v3429_v57 = vmax.f32 %v1039_v11, %v1056_v19 }
 0x293   : > { %4159 = vst [vmem:[#allocation39_spill] sm:$0xff] %v3429_v57  ;;  %v4117_v11 = vrot.slane %v3429_v57, 2 }
 0x295   : > { %1425 = vrot.lane.b32.xlu0 %v3293_v53, %s2534_s3  ;;  %1429 = vrot.lane.b32.xlu2 %v3295_v24, %s2534_s3 }
 0x296   : > { %1427 = vrot.lane.b32.xlu1 %v3301_v1, %s2534_s3 }
 0x297   : > { %v3400_v32 = vpop.permute.xlu2 %1067  ;;  %v1052_v31 = vpop.permute.xlu0 %1051 }
 0x298   : > { %v3402_v51 = vpop.permute.xlu1 %1047  ;;  %v1085_v10 = vmax.f32 %v1037_v15, %v1052_v31  ;;  %v4119_v15 = vrot.slane %v3396_v26, 2 }
 0x299   : > { %4157 = vst [vmem:[#allocation37_spill] sm:$0xff] %v3402_v51  ;;  %v3607_v51 = vld [vmem:[%s2634_s24 + $0x38] sm:$0xff] }
 0x29a   : > { %v1110_v13 = vrot.slane %v1085_v10, 1  ;;  %v1146_v39 = vrot.slane %v1085_v10, 2  ;;  %v1183_v55 = vrot.slane %v1085_v10, 3 }
 0x29c   : > { %v1111_v7 = vsel %vm457_vm3, %v4112_v2, %v1110_v13  ;;  %v1147_v3 = vsel %vm494_vm4, %v4119_v15, %v1146_v39  ;;  %v1220_v13 = vrot.slane %v1085_v10, 4  ;;  %v1184_v37 = vsel %vm1179_vm5, %v4114_v23, %v1183_v55 }
 0x29d   : > { %1431 = vrot.lane.b32.xlu0 %v3309_v20, %s2534_s3  ;;  %1435 = vrot.lane.b32.xlu2 %v3311_v42, %s2534_s3  ;;  %v1136_v9 = vmax.f32 %v3396_v26, %v1111_v7  ;;  %v4118_v2 = vrot.slane %v3429_v57, 1  ;;  %v4115_v23 = vrot.slane %v3429_v57, 4 }
 0x29e   : > { %1433 = vrot.lane.b32.xlu1 %v3317_v33, %s2534_s3  ;;  %v1221_v19 = vsel %vm1216_vm6, %v4113_v27, %v1220_v13 }
 0x29f   : > { %v3422_v52 = vpop.permute.xlu2 %1321  ;;  %v3424_v12 = vpop.permute.xlu0 %1057  ;;  %v1172_v61 = vmax.f32 %v1136_v9, %v1147_v3  ;;  %v949_v9 = vmax.f32 %v3149_v28, %v3241_v8  ;;  %v950_v28 = vmax.f32 %v3147_v45, %v3289_v0  ;;  %v948_v8 = vmax.f32 %v3151_v16, %v3291_v40 }
 0x2a0   : > { %4158 = vst [vmem:[#allocation38_spill] sm:$0xff] %v3424_v12  ;;  %v1054_v31 = vpop.permute.xlu1 %1053  ;;  %v2409_v12 = vld [vmem:[%s2628_s28 + $0x38] sm:$0xff] }
 0x2a1   : > { %v1086_v35 = vmax.f32 %v1038_v48, %v1054_v31  ;;  %v1209_v41 = vmax.f32 %v1172_v61, %v1184_v37 }
 0x2a3   : > { %v1112_v7 = vrot.slane %v1086_v35, 1  ;;  %v1148_v39 = vrot.slane %v1086_v35, 2  ;;  %v3444_v10 = vmax.f32 %v1209_v41, %v1221_v19  ;;  %v1185_v61 = vrot.slane %v1086_v35, 3 }
 0x2a4   : > { %v997_v41 = vmax.f32 %v949_v9, %v3305_v29  ;;  %v4116_v19 = vrot.slane %v3429_v57, 3  ;;  %v1222_v27 = vrot.slane %v1086_v35, 4  ;;  %v998_v29 = vmax.f32 %v950_v28, %v3343_v36 }
 0x2a5   : > { %1461 = vrot.lane.b32.xlu0 %v3257_v38, %s2535_s4  ;;  %1465 = vrot.lane.b32.xlu2 %v3259_v58, %s2535_s4  ;;  %4160 = vst [vmem:[#allocation40_spill] sm:$0xff] %v3444_v10  ;;  %v1114_v55 = vsel %vm457_vm3, %v1112_v7, %v4118_v2  ;;  %v1150_v37 = vsel %vm494_vm4, %v1148_v39, %v4117_v11  ;;  %v3601_v10 = vld [vmem:[%s2634_s24 + $0x30] sm:$0xff] }
 0x2a6   : > { %1463 = vrot.lane.b32.xlu1 %v3261_v4, %s2535_s4  ;;  %v1137_v31 = vmax.f32 %v1086_v35, %v1114_v55  ;;  %v1045_v55 = vmax.f32 %v997_v41, %v3353_v56  ;;  %v1187_v39 = vsel %vm1179_vm5, %v1185_v61, %v4116_v19  ;;  %v1224_v45 = vsel %vm1216_vm6, %v1222_v27, %v4115_v23 }
 0x2a7   : > { %v3454_v48 = vpop.permute.xlu2 %1327  ;;  %v3456_v3 = vpop.permute.xlu0 %1063  ;;  %v1046_v16 = vmax.f32 %v998_v29, %v3383_v5 }
 0x2a8   : > { %4161 = vst [vmem:[#allocation41_spill] sm:$0xff] %v3456_v3  ;;  %v3458_v13 = vpop.permute.xlu1 %1059  ;;  %v1173_v7 = vmax.f32 %v1137_v31, %v1150_v37  ;;  %v996_v31 = vmax.f32 %v948_v8, %v3345_v47  ;;  %v1093_v35 = vmax.f32 %v1045_v55, %v3400_v32  ;;  %v2407_v3 = vld [vmem:[%s2628_s28 + $0x30] sm:$0xff] }
 0x2a9   : > { %4162 = vst [vmem:[#allocation42_spill] sm:$0xff] %v3458_v13  ;;  %v1671_v13 = vmul.f32 %v3601_v10, %v2407_v3 }
 0x2aa   : > { %v1210_v9 = vmax.f32 %v1173_v7, %v1187_v39  ;;  %v1044_v47 = vmax.f32 %v996_v31, %v3387_v46  ;;  %v1123_v61 = vrot.slane %v1093_v35, 1  ;;  %v1159_v37 = vrot.slane %v1093_v35, 2 }
 0x2ab   : > { %v1196_v7 = vrot.slane %v1093_v35, 3 }
 0x2ac   : > { %v3487_v36 = vmax.f32 %v1210_v9, %v1224_v45  ;;  %v1233_v9 = vrot.slane %v1093_v35, 4 }
 0x2ad   : > { %1467 = vrot.lane.b32.xlu0 %v3277_v62, %s2535_s4  ;;  %1471 = vrot.lane.b32.xlu2 %v3275_v63, %s2535_s4 }
 0x2ae   : > { %1469 = vrot.lane.b32.xlu1 %v3281_v34, %s2535_s4  ;;  %4163 = vst [vmem:[#allocation43_spill] sm:$0xff] %v3487_v36 }
 0x2af   : > { %v1334_v0 = vpop.permute.xlu2 %1333  ;;  %v1070_v40 = vpop.permute.xlu0 %1069 }
 0x2b0   : > { %v1066_v56 = vpop.permute.xlu1 %1065  ;;  %v1094_v32 = vmax.f32 %v1046_v16, %v1070_v40 }
 0x2b1   : > { %v1092_v41 = vmax.f32 %v1044_v47, %v1066_v56 }
 0x2b2   : > { %v1125_v28 = vrot.slane %v1094_v32, 1  ;;  %v1161_v8 = vrot.slane %v1094_v32, 2  ;;  %v1198_v27 = vrot.slane %v1094_v32, 3  ;;  %v1235_v55 = vrot.slane %v1094_v32, 4 }
 0x2b3   : > { %v1122_v5 = vrot.slane %v1092_v41, 1  ;;  %v1158_v39 = vrot.slane %v1092_v41, 2  ;;  %v1195_v29 = vrot.slane %v1092_v41, 3  ;;  %v1232_v23 = vrot.slane %v1092_v41, 4 }
 0x2b4   : > { %v1126_v45 = vsel %vm457_vm3, %v1123_v61, %v1125_v28  ;;  %v1162_v46 = vsel %vm494_vm4, %v1159_v37, %v1161_v8  ;;  %v1199_v31 = vsel %vm1179_vm5, %v1196_v7, %v1198_v27  ;;  %v1236_v19 = vsel %vm1216_vm6, %v1233_v9, %v1235_v55 }
 0x2b5   : > { %1473 = vrot.lane.b32.xlu0 %v3293_v53, %s2535_s4  ;;  %1477 = vrot.lane.b32.xlu2 %v3295_v24, %s2535_s4  ;;  %v1124_v16 = vsel %vm457_vm3, %v1122_v5, %v1123_v61  ;;  %v1160_v47 = vsel %vm494_vm4, %v1158_v39, %v1159_v37  ;;  %v1197_v40 = vsel %vm1179_vm5, %v1195_v29, %v1196_v7 }
 0x2b6   : > { %1475 = vrot.lane.b32.xlu1 %v3301_v1, %s2535_s4  ;;  %v1141_v56 = vmax.f32 %v1092_v41, %v1124_v16  ;;  %v1234_v32 = vsel %vm1216_vm6, %v1232_v23, %v1233_v9  ;;  %v1142_v28 = vmax.f32 %v1093_v35, %v1126_v45  ;;  %v1355_v23 = vmax.f32 %v3259_v58, %v3422_v52 }
 0x2b7   : > { %v3503_v8 = vpop.permute.xlu2 %1339  ;;  %v1318_v27 = vpop.permute.xlu0 %1317  ;;  %v1361_v58 = vmax.f32 %v3295_v24, %v1334_v0 }
 0x2b8   : > { %v1320_v11 = vpop.permute.xlu1 %1319  ;;  %v1177_v2 = vmax.f32 %v1141_v56, %v1160_v47  ;;  %v1178_v15 = vmax.f32 %v1142_v28, %v1162_v46 }
 0x2ba   : > { %v1214_v61 = vmax.f32 %v1177_v2, %v1197_v40  ;;  %v1215_v5 = vmax.f32 %v1178_v15, %v1199_v31 }
 0x2bc   : > { %v3506_v37 = vmax.f32 %v1214_v61, %v1234_v32  ;;  %v3508_v7 = vmax.f32 %v1215_v5, %v1236_v19  ;;  %v1358_v19 = vmax.f32 %v3275_v63, %v3454_v48  ;;  %v1353_v63 = vmax.f32 %v3257_v38, %v1318_v27 }
 0x2bd   : > { %1479 = vrot.lane.b32.xlu0 %v3309_v20, %s2535_s4  ;;  %1483 = vrot.lane.b32.xlu2 %v3311_v42, %s2535_s4  ;;  %v1354_v48 = vmax.f32 %v3261_v4, %v1320_v11  ;;  %v3548_v4 = vld [vmem:[%s2628_s28 + $0x10] sm:$0xff] }
 0x2be   : > { %4164 = vst [vmem:[#allocation44_spill] sm:$0xff] %v3506_v37  ;;  %1481 = vrot.lane.b32.xlu1 %v3317_v33, %s2535_s4  ;;  %v3551_v11 = vld [vmem:[%s2634_s24 + $0x10] sm:$0xff] }
 0x2bf   : > { %4165 = vst [vmem:[#allocation45_spill] sm:$0xff] %v3508_v7  ;;  %v1370_v35 = vpop.permute.xlu2 %1369  ;;  %v1324_v41 = vpop.permute.xlu0 %1323  ;;  %v1667_v27 = vmul.f32 %v3551_v11, %v3548_v4 }
 0x2c0   : > { %v1326_v2 = vpop.permute.xlu1 %1325  ;;  %v3518_v15 = vmax.f32 %v1355_v23, %v1370_v35  ;;  %v1356_v56 = vmax.f32 %v3277_v62, %v1324_v41  ;;  %v2397_v23 = vld [vmem:[%s2628_s28] sm:$0xff]  ;;  %v2399_v41 = vld [vmem:[%s2628_s28 + $0x8] sm:$0xff] }
 0x2c1   : > { %v1357_v32 = vmax.f32 %v3281_v34, %v1326_v2  ;;  %v3559_v62 = vld [vmem:[%s2634_s24] sm:$0xff]  ;;  %v3566_v2 = vld [vmem:[%s2634_s24 + $0x8] sm:$0xff]  ;;  %v1733_v30 = vsel %vm1673_vm7, %v2397_v23, 0.0 }
 0x2c2   : > { %v1665_v34 = vmul.f32 %v3559_v62, %v2397_v23 }
 0x2c7   : > { %v1376_v55 = vpop.permute.xlu2 %1375  ;;  %v3522_v39 = vpop.permute.xlu0 %1329 }
 0x2c8   : > { %v3524_v29 = vmax.f32 %v1358_v19, %v1376_v55  ;;  %v3526_v9 = vpop.permute.xlu1 %1331  ;;  %v1666_v19 = vmul.f32 %v3566_v2, %v2399_v41  ;;  %v1680_v55 = vsel %vm1673_vm7, %v1667_v27, 0.0  ;;  %v3585_v27 = vld [vmem:[%s2634_s24 + $0x20] sm:$0xff] }
 0x2cf   : > { %v1382_v52 = vpop.permute.xlu2 %1381  ;;  %v3529_v45 = vpop.permute.xlu0 %1335 }
 0x2d0   : > { %v3531_v46 = vmax.f32 %v1361_v58, %v1382_v52  ;;  %v3533_v31 = vpop.permute.xlu1 %1337  ;;  %v1674_v58 = vsel %vm1673_vm7, %v1665_v34, 0.0  ;;  %v1677_v52 = vsel %vm1673_vm7, %v1666_v19, 0.0  ;;  %v3589_v34 = vld [vmem:[%s2628_s28 + $0x28] sm:$0xff] }
 0x2d1   : > { %v3592_v19 = vld [vmem:[%s2634_s24 + $0x28] sm:$0xff] }
 0x2d7   : > { %v3537_v16 = vpop.permute.xlu2 %1387  ;;  %v1366_v47 = vpop.permute.xlu0 %1365 }
 0x2d8   : > { %v1368_v40 = vpop.permute.xlu1 %1367  ;;  %v3539_v24 = vmax.f32 %v1353_v63, %v1366_v47  ;;  %v2401_v47 = vld [vmem:[%s2628_s28 + $0x18] sm:$0xff] }
 0x2d9   : > { %v3541_v0 = vmax.f32 %v1354_v48, %v1368_v40  ;;  %v3578_v40 = vld [vmem:[%s2634_s24 + $0x18] sm:$0xff] }
 0x2df   : > { %v3545_v28 = vpop.permute.xlu2 %1417  ;;  %v1372_v38 = vpop.permute.xlu0 %1371 }
 0x2e0   : > { %v1374_v61 = vpop.permute.xlu1 %1373  ;;  %v3555_v5 = vmax.f32 %v1356_v56, %v1372_v38  ;;  %v1668_v56 = vmul.f32 %v3578_v40, %v2401_v47  ;;  %v2403_v38 = vld [vmem:[%s2628_s28 + $0x20] sm:$0xff] }
 0x2e1   : > { %v3562_v35 = vmax.f32 %v1357_v32, %v1374_v61  ;;  %v1669_v61 = vmul.f32 %v3585_v27, %v2403_v38 }
 0x2e6   : > { %1681 = vadd.xlane.f32.xlu2 %v1680_v55  ;;  %v1670_v55 = vmul.f32 %v3592_v19, %v3589_v34 }
 0x2e7   : > { %1675 = vadd.xlane.f32.xlu0 %v1674_v58  ;;  %v3572_v63 = vpop.permute.xlu2 %1423  ;;  %v3574_v48 = vpop.permute.xlu0 %1377  ;;  %v1683_v58 = vsel %vm1673_vm7, %v1668_v56, 0.0  ;;  %v1672_v56 = vmul.f32 %v3607_v51, %v2409_v12 }
 0x2e8   : > { %1678 = vadd.xlane.f32.xlu1 %v1677_v52  ;;  %v3581_v32 = vpop.permute.xlu1 %1379  ;;  %v1686_v52 = vsel %vm1673_vm7, %v1669_v61, 0.0  ;;  %v1689_v7 = vsel %vm1673_vm7, %v1670_v55, 0.0  ;;  %v1692_v61 = vsel %vm1673_vm7, %v1671_v13, 0.0 }
 0x2e9   : > { %v1695_v55 = vsel %vm1673_vm7, %v1672_v56, 0.0  ;;  %v1742_v56 = vsel %vm1673_vm7, %v2401_v47, 0.0 }
 0x2ee   : > { %1684 = vadd.xlane.f32.xlu2 %v1683_v58 }
 0x2ef   : > { %1687 = vadd.xlane.f32.xlu0 %v1686_v52  ;;  %v1430_v37 = vpop.permute.xlu2 %1429  ;;  %v1384_v36 = vpop.permute.xlu0 %1383 }
 0x2f0   : > { %v1457_v57 = vmax.f32 %v3531_v46, %v1430_v37  ;;  %1690 = vadd.xlane.f32.xlu1 %v1689_v7  ;;  %v1386_v26 = vpop.permute.xlu1 %1385  ;;  %v1736_v37 = vsel %vm1673_vm7, %v2399_v41, 0.0 }
 0x2f6   : > { %1693 = vadd.xlane.f32.xlu2 %v1692_v61  ;;  %v1745_v61 = vsel %vm1673_vm7, %v2403_v38, 0.0  ;;  %v1451_v38 = vmax.f32 %v3518_v15, %v3545_v28  ;;  %v1362_v15 = vmax.f32 %v3309_v20, %v3529_v45 }
 0x2f7   : > { %1696 = vadd.xlane.f32.xlu0 %v1695_v55  ;;  %v3612_v58 = vpop.permute.xlu2 %1435  ;;  %v1414_v52 = vpop.permute.xlu0 %1413 }
 0x2f8   : > { %v1416_v60 = vpop.permute.xlu1 %1415 }
 0x2f9   : > { %v1450_v20 = vmax.f32 %v3541_v0, %v1416_v60 }
 0x2fe   : > { %1734 = vadd.xlane.f32.xlu2 %v1733_v30  ;;  %v1751_v30 = vsel %vm1673_vm7, %v2407_v3, 0.0  ;;  %v1364_v3 = vmax.f32 %v3311_v42, %v3503_v8  ;;  %v1454_v42 = vmax.f32 %v3524_v29, %v3572_v63  ;;  %v1449_v8 = vmax.f32 %v3539_v24, %v1414_v52 }
 0x2ff   : > { %1737 = vadd.xlane.f32.xlu0 %v1736_v37  ;;  %v1466_v7 = vpop.permute.xlu2 %1465  ;;  %v3616_v46 = vpop.permute.xlu0 %1419  ;;  %v1754_v37 = vsel %vm1673_vm7, %v2409_v12, 0.0  ;;  %v1359_v12 = vmax.f32 %v3293_v53, %v3522_v39  ;;  %v3666_v39 = vmax.f32 %v1362_v15, %v1384_v36  ;;  %v1796_v24 = vsel %vm1673_vm7, %v3585_v27, 0.0 }
 0x300   : > { %v3618_v14 = vpop.permute.xlu1 %1421  ;;  %v1499_v28 = vmax.f32 %v1451_v38, %v1466_v7 }
 0x301   : > { %v3658_v53 = vmax.f32 %v1359_v12, %v3574_v48  ;;  %v1453_v36 = vmax.f32 %v3562_v35, %v3618_v14 }
 0x302   : > { %v1596_v60 = vrot.slane %v1499_v28, 3  ;;  %v1632_v0 = vrot.slane %v1499_v28, 4 }
 0x306   : > { %1743 = vadd.xlane.f32.xlu2 %v1742_v56  ;;  %v1784_v56 = vsel %vm1673_vm7, %v3559_v62, 0.0  ;;  %v3653_v62 = vmax.f32 %v1364_v3, %v3537_v16  ;;  %v1793_v16 = vsel %vm1673_vm7, %v3578_v40, 0.0 }
 0x307   : > { %1746 = vadd.xlane.f32.xlu0 %v1745_v61  ;;  %v1472_v55 = vpop.permute.xlu2 %1471  ;;  %v3624_v23 = vpop.permute.xlu0 %1425  ;;  %v1787_v61 = vsel %vm1673_vm7, %v3566_v2, 0.0  ;;  %v1524_v2 = vrot.slane %v1499_v28, 1 }
 0x308   : > { %v3626_v41 = vpop.permute.xlu1 %1427  ;;  %v1460_v29 = vmax.f32 %v3653_v62, %v3612_v58  ;;  %v1502_v48 = vmax.f32 %v1454_v42, %v1472_v55 }
 0x30e   : > { %1752 = vadd.xlane.f32.xlu2 %v1751_v30 }
 0x30f   : > { %1755 = vadd.xlane.f32.xlu0 %v1754_v37  ;;  %v1478_v50 = vpop.permute.xlu2 %1477  ;;  %v3630_v21 = vpop.permute.xlu0 %1431 }
 0x310   : > { %v3632_v13 = vmax.f32 %v1457_v57, %v1478_v50  ;;  %v3634_v47 = vpop.permute.xlu1 %1433  ;;  %v1360_v50 = vmax.f32 %v3301_v1, %v3526_v9  ;;  %v1363_v57 = vmax.f32 %v3317_v33, %v3533_v31 }
 0x312   : > { %v3662_v1 = vmax.f32 %v1360_v50, %v3581_v32  ;;  %v3664_v33 = vmax.f32 %v1363_v57, %v1386_v26  ;;  %v1560_v26 = vrot.slane %v1499_v28, 2  ;;  %v1802_v32 = vsel %vm1673_vm7, %v3601_v10, 0.0 }
 0x313   : > { %v1455_v57 = vmax.f32 %v3658_v53, %v3624_v23  ;;  %v1805_v28 = vsel %vm1673_vm7, %v3607_v51, 0.0  ;;  %v1529_v23 = vrot.slane %v1502_v48, 1  ;;  %v1565_v53 = vrot.slane %v1502_v48, 2 }
 0x316   : > { %1785 = vadd.xlane.f32.xlu2 %v1784_v56 }
 0x317   : > { %1788 = vadd.xlane.f32.xlu0 %v1787_v61  ;;  %v1462_v9 = vpop.permute.xlu0 %1461 }
 0x318   : > { %v1464_v45 = vpop.permute.xlu1 %1463  ;;  %v1497_v31 = vmax.f32 %v1449_v8, %v1462_v9 }
 0x319   : > { %v1498_v63 = vmax.f32 %v1450_v20, %v1464_v45  ;;  %v1456_v20 = vmax.f32 %v3662_v1, %v3626_v41  ;;  %v4166_v45 = vmax.f32 %v3555_v5, %v3616_v46  ;;  %v1637_v41 = vrot.slane %v1502_v48, 4 }
 0x31a   : > { %v1521_v37 = vrot.slane %v1497_v31, 1  ;;  %v1557_v40 = vrot.slane %v1497_v31, 2  ;;  %v1593_v38 = vrot.slane %v1497_v31, 3  ;;  %v1629_v27 = vrot.slane %v1497_v31, 4 }
 0x31b   : > { %v1522_v52 = vrot.slane %v1498_v63, 1  ;;  %v1558_v7 = vrot.slane %v1498_v63, 2  ;;  %v1594_v30 = vrot.slane %v1498_v63, 3  ;;  %v1630_v56 = vrot.slane %v1498_v63, 4 }
 0x31d   : > { %v1525_v3 = vsel %vm457_vm3, %v1522_v52, %v1524_v2  ;;  %v1523_v12 = vsel %vm457_vm3, %v1521_v37, %v1522_v52  ;;  %v1561_v14 = vsel %vm494_vm4, %v1558_v7, %v1560_v26  ;;  %v1597_v35 = vsel %vm1179_vm5, %v1594_v30, %v1596_v60 }
 0x31e   : > { %v1550_v55 = vmax.f32 %v1498_v63, %v1525_v3  ;;  %v1549_v61 = vmax.f32 %v1497_v31, %v1523_v12  ;;  %1794 = vadd.xlane.f32.xlu2 %v1793_v16  ;;  %v1633_v10 = vsel %vm1216_vm6, %v1630_v56, %v1632_v0  ;;  %v1559_v50 = vsel %vm494_vm4, %v1557_v40, %v1558_v7 }
 0x31f   : > { %1797 = vadd.xlane.f32.xlu0 %v1796_v24  ;;  %v1468_v15 = vpop.permute.xlu0 %1467  ;;  %v1595_v42 = vsel %vm1179_vm5, %v1593_v38, %v1594_v30  ;;  %v1631_v8 = vsel %vm1216_vm6, %v1629_v27, %v1630_v56  ;;  %v1601_v24 = vrot.slane %v1502_v48, 3  ;;  %v1458_v48 = vmax.f32 %v3666_v39, %v3630_v21  ;;  %v1484_v39 = vpop.permute.xlu2 %1483 }
 0x320   : > { %v1470_v9 = vpop.permute.xlu1 %1469  ;;  %v1500_v31 = vmax.f32 %v4166_v45, %v1468_v15  ;;  %v1586_v16 = vmax.f32 %v1550_v55, %v1561_v14  ;;  %v1585_v2 = vmax.f32 %v1549_v61, %v1559_v50  ;;  %v1534_v50 = vrot.slane %v3632_v13, 1 }
 0x321   : > { %v1501_v26 = vmax.f32 %v1453_v36, %v1470_v9  ;;  %v1570_v9 = vrot.slane %v3632_v13, 2  ;;  %v1606_v45 = vrot.slane %v3632_v13, 3  ;;  %v1642_v21 = vrot.slane %v3632_v13, 4 }
 0x322   : > { %v1526_v63 = vrot.slane %v1500_v31, 1  ;;  %v1562_v51 = vrot.slane %v1500_v31, 2  ;;  %v1598_v60 = vrot.slane %v1500_v31, 3  ;;  %v1622_v0 = vmax.f32 %v1586_v16, %v1597_v35 }
 0x323   : > { %v1527_v52 = vrot.slane %v1501_v26, 1  ;;  %v1563_v7 = vrot.slane %v1501_v26, 2  ;;  %v1599_v30 = vrot.slane %v1501_v26, 3  ;;  %v1621_v37 = vmax.f32 %v1585_v2, %v1595_v42 }
 0x324   : > { %v3696_v1 = vmax.f32 %v1622_v0, %v1633_v10  ;;  %v1635_v40 = vrot.slane %v1501_v26, 4  ;;  %v1634_v5 = vrot.slane %v1500_v31, 4 }
 0x325   : > { %v1530_v46 = vsel %vm457_vm3, %v1527_v52, %v1529_v23  ;;  %v1528_v38 = vsel %vm457_vm3, %v1526_v63, %v1527_v52  ;;  %v3700_v56 = vmax.f32 %v1621_v37, %v1631_v8  ;;  %v1566_v36 = vsel %vm494_vm4, %v1563_v7, %v1565_v53 }
 0x326   : > { %v1552_v27 = vmax.f32 %v1501_v26, %v1530_v46  ;;  %v1551_v3 = vmax.f32 %v1500_v31, %v1528_v38  ;;  %1803 = vadd.xlane.f32.xlu2 %v1802_v32  ;;  %v1602_v12 = vsel %vm1179_vm5, %v1599_v30, %v1601_v24  ;;  %v1638_v14 = vsel %vm1216_vm6, %v1635_v40, %v1637_v41 }
 0x327   : > { %1806 = vadd.xlane.f32.xlu0 %v1805_v28  ;;  %v1474_v35 = vpop.permute.xlu0 %1473  ;;  %v1564_v55 = vsel %vm494_vm4, %v1562_v51, %v1563_v7  ;;  %v1600_v61 = vsel %vm1179_vm5, %v1598_v60, %v1599_v30  ;;  %v1636_v10 = vsel %vm1216_vm6, %v1634_v5, %v1635_v40  ;;  %v1459_v30 = vmax.f32 %v3664_v33, %v3634_v47 }
 0x328   : > { %v1476_v15 = vpop.permute.xlu1 %1475  ;;  %v1503_v42 = vmax.f32 %v1455_v57, %v1474_v35  ;;  %v1588_v32 = vmax.f32 %v1552_v27, %v1566_v36  ;;  %v1587_v8 = vmax.f32 %v1551_v3, %v1564_v55  ;;  %v1508_v57 = vmax.f32 %v1460_v29, %v1484_v39 }
 0x329   : > { %v1504_v28 = vmax.f32 %v1456_v20, %v1476_v15 }
 0x32a   : > { %v1531_v31 = vrot.slane %v1503_v42, 1  ;;  %v1567_v16 = vrot.slane %v1503_v42, 2  ;;  %v1603_v2 = vrot.slane %v1503_v42, 3  ;;  %v1624_v23 = vmax.f32 %v1588_v32, %v1602_v12 }
 0x32b   : > { %v1532_v53 = vrot.slane %v1504_v28, 1  ;;  %v1568_v24 = vrot.slane %v1504_v28, 2  ;;  %v1604_v26 = vrot.slane %v1504_v28, 3  ;;  %v1639_v63 = vrot.slane %v1503_v42, 4 }
 0x32c   : > { %v1660_v51 = vmax.f32 %v1624_v23, %v1638_v14  ;;  %v1640_v60 = vrot.slane %v1504_v28, 4  ;;  %v1623_v0 = vmax.f32 %v1587_v8, %v1600_v61  ;;  %v1539_v12 = vrot.slane %v1508_v57, 1 }
 0x32d   : > { %v1535_v52 = vsel %vm457_vm3, %v1532_v53, %v1534_v50  ;;  %v1533_v13 = vsel %vm457_vm3, %v1531_v31, %v1532_v53  ;;  %v1569_v20 = vsel %vm494_vm4, %v1567_v16, %v1568_v24  ;;  %v1605_v7 = vsel %vm1179_vm5, %v1603_v2, %v1604_v26 }
 0x32e   : > { %v1554_v37 = vmax.f32 %v1504_v28, %v1535_v52  ;;  %v1553_v41 = vmax.f32 %v1503_v42, %v1533_v13  ;;  %v1641_v40 = vsel %vm1216_vm6, %v1639_v63, %v1640_v60  ;;  %v3724_v62 = vmax.f32 %v1623_v0, %v1636_v10 }
 0x32f   : > { %v1480_v58 = vpop.permute.xlu0 %1479  ;;  %v1571_v29 = vsel %vm494_vm4, %v1568_v24, %v1570_v9  ;;  %v1607_v5 = vsel %vm1179_vm5, %v1604_v26, %v1606_v45  ;;  %v1643_v46 = vsel %vm1216_vm6, %v1640_v60, %v1642_v21  ;;  %v1575_v14 = vrot.slane %v1508_v57, 2 }
 0x330   : > { %v1482_v38 = vpop.permute.xlu1 %1481  ;;  %v1506_v36 = vmax.f32 %v1458_v48, %v1480_v58  ;;  %v1589_v27 = vmax.f32 %v1553_v41, %v1569_v20  ;;  %v1590_v3 = vmax.f32 %v1554_v37, %v1571_v29  ;;  %v1611_v47 = vrot.slane %v1508_v57, 3 }
 0x331   : > { %v1507_v33 = vmax.f32 %v1459_v30, %v1482_v38  ;;  %v1647_v8 = vrot.slane %v1508_v57, 4 }
 0x332   : > { %v1536_v35 = vrot.slane %v1506_v36, 1  ;;  %v1572_v55 = vrot.slane %v1506_v36, 2  ;;  %v1608_v61 = vrot.slane %v1506_v36, 3  ;;  %v1625_v50 = vmax.f32 %v1589_v27, %v1605_v7 }
 0x333   : > { %v1537_v10 = vrot.slane %v1507_v33, 1  ;;  %v1573_v15 = vrot.slane %v1507_v33, 2  ;;  %v1609_v42 = vrot.slane %v1507_v33, 3  ;;  %v1644_v32 = vrot.slane %v1506_v36, 4 }
 0x334   : > { %v1661_v9 = vmax.f32 %v1625_v50, %v1641_v40  ;;  %v1645_v45 = vrot.slane %v1507_v33, 4  ;;  %v1626_v21 = vmax.f32 %v1590_v3, %v1607_v5  ;;  %v1706_v7 = vlaneseq }
 0x335   : > { %v1540_v48 = vsel %vm457_vm3, %v1537_v10, %v1539_v12  ;;  %v1538_v39 = vsel %vm457_vm3, %v1536_v35, %v1537_v10  ;;  %v1574_v28 = vsel %vm494_vm4, %v1572_v55, %v1573_v15  ;;  %v1610_v31 = vsel %vm1179_vm5, %v1608_v61, %v1609_v42 }
 0x336   : > { %v1556_v16 = vmax.f32 %v1507_v33, %v1540_v48  ;;  %v1555_v2 = vmax.f32 %v1506_v36, %v1538_v39  ;;  %v1646_v23 = vsel %vm1216_vm6, %v1644_v32, %v1645_v45  ;;  %v1576_v53 = vsel %vm494_vm4, %v1573_v15, %v1575_v14 }
 0x337   : > { %v1612_v24 = vsel %vm1179_vm5, %v1609_v42, %v1611_v47  ;;  %v1648_v26 = vsel %vm1216_vm6, %v1645_v45, %v1647_v8  ;;  %v3737_v63 = vmax.f32 %v1626_v21, %v1643_v46  ;;  %v3747_v40 = vand.u32 127, %v1706_v7 }
 0x338   : > { %v1591_v57 = vmax.f32 %v1555_v2, %v1574_v28  ;;  %v1592_v60 = vmax.f32 %v1556_v16, %v1576_v53  ;;  %v1739_v21 = vsel %vm1673_vm7, %v3548_v4, 0.0 }
 0x33a   : > { %v1627_v0 = vmax.f32 %v1591_v57, %v1610_v31  ;;  %v1628_v52 = vmax.f32 %v1592_v60, %v1612_v24  ;;  %v1748_v31 = vsel %vm1673_vm7, %v3589_v34, 0.0 }
 0x33b   : > { %1845 = vrot.lane.b32.xlu0 %v3696_v1, %s2530_s20  ;;  %v3750_v1 = vadd.s32 4294967288, %v3747_v40 }
 0x33c   : > { %v1663_v13 = vmax.f32 %v1627_v0, %v1646_v23  ;;  %v1664_v20 = vmax.f32 %v1628_v52, %v1648_v26 }
 0x33e   : > { %1843 = vrot.lane.b32.xlu2 %v3700_v56, %s2530_s20 }
 0x343   : > { %1849 = vrot.lane.b32.xlu0 %v1660_v51, %s2530_s20 }
 0x346   : > { %1851 = vrot.lane.b32.xlu2 %v1661_v9, %s2530_s20 }
 0x34b   : > { %1855 = vrot.lane.b32.xlu0 %v1663_v13, %s2530_s20 }
 0x34e   : > { %1857 = vrot.lane.b32.xlu2 %v1664_v20, %s2530_s20 }
 0x359   : > { %v1682_v30 = vpop.xlane.xlu2 %1681 }
 0x35a   : > { %v1676_v37 = vpop.xlane.xlu0 %1675  ;;  %v1713_v5 = vperm.slane %v1682_v30, %v3747_v40 }
 0x35b   : > { %v1679_v41 = vpop.xlane.xlu1 %1678  ;;  %v1708_v38 = vperm.slane %v1676_v37, %v3747_v40 }
 0x35c   : > { %v1710_v46 = vperm.slane %v1679_v41, %v3750_v1 }
 0x35e   : > { %v1712_v12 = vsel %vm1711_vm8, %v1710_v46, %v1708_v38 }
 0x361   : > { %v1685_v58 = vpop.xlane.xlu2 %1684 }
 0x362   : > { %v1688_v29 = vpop.xlane.xlu0 %1687  ;;  %v1714_v56 = vperm.slane %v1685_v58, %v3750_v1 }
 0x363   : > { %v1691_v51 = vpop.xlane.xlu1 %1690  ;;  %v1716_v27 = vperm.slane %v1688_v29, %v3747_v40 }
 0x364   : > { %v1717_v36 = vperm.slane %v1691_v51, %v3750_v1  ;;  %v1715_v3 = vsel %vm1711_vm8, %v1714_v56, %v1713_v5 }
 0x365   : > { %v1723_v55 = vsel %vm1722_vm9, %v1715_v3, %v1712_v12 }
 0x366   : > { %v1718_v47 = vsel %vm1711_vm8, %v1717_v36, %v1716_v27 }
 0x367   : > { %v1725_v10 = vsel %vm1724_vm10, %v1718_v47, %v1723_v55 }
 0x369   : > { %v1694_v14 = vpop.xlane.xlu2 %1693 }
 0x36a   : > { %v1719_v33 = vperm.slane %v1694_v14, %v3747_v40  ;;  %v1697_v35 = vpop.xlane.xlu0 %1696 }
 0x36b   : > { %v1720_v61 = vperm.slane %v1697_v35, %v3750_v1 }
 0x36d   : > { %v1721_v50 = vsel %vm1711_vm8, %v1720_v61, %v1719_v33  ;;  %v1790_v61 = vsel %vm1673_vm7, %v3551_v11, 0.0 }
 0x36e   : > { %v1727_v15 = vsel %vm1726_vm11, %v1721_v50, %v1725_v10  ;;  %v1799_v50 = vsel %vm1673_vm7, %v3592_v19, 0.0 }
 0x36f   : > { %v1730_v42 = vsel %vm1729_vm12, %v1727_v15, 0.0 }
 0x370   : > { %1731 = vadd.xlane.f32.xlu1 %v1730_v42 }
 0x371   : > { %v1735_v32 = vpop.xlane.xlu2 %1734 }
 0x372   : > { %v1765_v8 = vperm.slane %v1735_v32, %v3747_v40  ;;  %v1738_v9 = vpop.xlane.xlu0 %1737 }
 0x373   : > { %v1766_v45 = vperm.slane %v1738_v9, %v3750_v1 }
 0x375   : > { %v1767_v48 = vsel %vm1711_vm8, %v1766_v45, %v1765_v8 }
 0x378   : > { %1740 = vadd.xlane.f32.xlu1 %v1739_v21 }
 0x379   : > { %v1744_v39 = vpop.xlane.xlu2 %1743 }
 0x37a   : > { %v1747_v28 = vpop.xlane.xlu0 %1746 }
 0x37b   : > { %v1771_v12 = vperm.slane %v1747_v28, %v3747_v40 }
 0x380   : > { %1749 = vadd.xlane.f32.xlu1 %v1748_v31 }
 0x381   : > { %v1753_v16 = vpop.xlane.xlu2 %1752 }
 0x382   : > { %v1756_v2 = vpop.xlane.xlu0 %1755  ;;  %v1774_v58 = vperm.slane %v1753_v16, %v3747_v40 }
 0x383   : > { %v1775_v29 = vperm.slane %v1756_v2, %v3750_v1 }
 0x385   : > { %v1776_v56 = vsel %vm1711_vm8, %v1775_v29, %v1774_v58 }
 0x389   : > { %v1786_v23 = vpop.xlane.xlu2 %1785 }
 0x38a   : > { %v1816_v53 = vperm.slane %v1786_v23, %v3747_v40  ;;  %v1789_v24 = vpop.xlane.xlu0 %1788 }
 0x38b   : > { %v1817_v26 = vperm.slane %v1789_v24, %v3750_v1 }
 0x38d   : > { %v1818_v57 = vsel %vm1711_vm8, %v1817_v26, %v1816_v53 }
 0x391   : > { %v1795_v4 = vpop.xlane.xlu2 %1794 }
 0x392   : > { %v1798_v60 = vpop.xlane.xlu0 %1797  ;;  %v1820_v9 = vperm.slane %v1795_v4, %v3750_v1 }
 0x399   : > { %v1804_v0 = vpop.xlane.xlu2 %1803 }
 0x39a   : > { %v1807_v52 = vpop.xlane.xlu0 %1806  ;;  %v1825_v10 = vperm.slane %v1804_v0, %v3747_v40 }
 0x39b   : > { %v1826_v15 = vperm.slane %v1807_v52, %v3750_v1 }
 0x39d   : > { %v1827_v42 = vsel %vm1711_vm8, %v1826_v15, %v1825_v10  ;;  %v4175_v15 = vld [vmem:[#allocation27_spill] sm:$0xff] }
 0x3a1   : > { %v1844_v13 = vpop.permute.xlu2 %1843 }
 0x3a2   : > { %v1867_v53 = vmul.f32 %v1844_v13, %v2952_v44 }
 0x3a9   : > { %v1852_v7 = vpop.permute.xlu2 %1851 }
 0x3aa   : > { %v1871_v30 = vmul.f32 %v1852_v7, %v2995_v18 }
 0x3ad   : > { %v1846_v20 = vpop.permute.xlu0 %1845 }
 0x3ae   : > { %v1868_v34 = vmul.f32 %v1846_v20, %v2949_v49 }
 0x3b0   : > { %1885 = vrot.lane.b32.xlu0 %v1868_v34, %s2532_s29 }
 0x3b1   : > { %v1858_v37 = vpop.permute.xlu2 %1857 }
 0x3b2   : > { %v1874_v41 = vmul.f32 %v1858_v37, %v3008_v43 }
 0x3b5   : > { %v1850_v24 = vpop.permute.xlu0 %1849 }
 0x3b6   : > { %v1870_v26 = vmul.f32 %v1850_v24, %v2971_v54 }
 0x3b8   : > { %1891 = vrot.lane.b32.xlu0 %v1871_v30, %s2532_s29 }
 0x3c0   : > { %1897 = vrot.lane.b32.xlu0 %v1874_v41, %s2532_s29 }
 0x3c8   : > { %1962 = vrot.lane.b32.xlu0 %v2974_v22, %s2532_s29 }
 0x3d0   : > { %1966 = vrot.lane.b32.xlu0 %v2995_v18, %s2532_s29  ;;  %v1769_v18 = vperm.slane %v1744_v39, %v3750_v1  ;;  %v1822_v39 = vperm.slane %v1798_v60, %v3747_v40 }
 0x3e3   : > { %v1732_v51 = vpop.xlane.xlu1 %1731 }
 0x3e4   : > { %v2168_v5 = vperm.slane %v1732_v51, %v3747_v40 }
 0x3e6   : > { %2171 = vst.msk [vmem:[%s3796_s8] sm:$0x1] %vm2170_vm13, %v2168_v5 }
 0x3eb   : > { %v1741_v46 = vpop.xlane.xlu1 %1740 }
 0x3ec   : > { %v1768_v38 = vperm.slane %v1741_v46, %v3747_v40  ;;  %v4169_v46 = vld [vmem:[#allocation15_spill] sm:$0xff] }
 0x3ee   : > { %v1770_v36 = vsel %vm1711_vm8, %v1769_v18, %v1768_v38  ;;  %v4168_v18 = vld [vmem:[#allocation21_spill] sm:$0xff] }
 0x3ef   : > { %v1777_v27 = vsel %vm1722_vm9, %v1770_v36, %v1767_v48  ;;  %v939_v38 = vmax.f32 %v4169_v46, %v4168_v18 }
 0x3f3   : > { %v1750_v3 = vpop.xlane.xlu1 %1749 }
 0x3f4   : > { %v1772_v14 = vperm.slane %v1750_v3, %v3750_v1  ;;  %v4170_v3 = vld [vmem:[#allocation26_spill] sm:$0xff] }
 0x3f6   : > { %v1773_v47 = vsel %vm1711_vm8, %v1772_v14, %v1771_v12  ;;  %v987_v12 = vmax.f32 %v939_v38, %v4170_v3 }
 0x3f7   : > { %v1778_v33 = vsel %vm1724_vm10, %v1773_v47, %v1777_v27  ;;  %v4171_v47 = vld [vmem:[#allocation31_spill] sm:$0xff] }
 0x3f8   : > { %v1779_v35 = vsel %vm1726_vm11, %v1776_v56, %v1778_v33  ;;  %v1035_v33 = vmax.f32 %v987_v12, %v4171_v47 }
 0x3f9   : > { %v1781_v55 = vsel %vm1729_vm12, %v1779_v35, 0.0  ;;  %v4172_v35 = vld [vmem:[#allocation37_spill] sm:$0xff] }
 0x3fa   : > { %1782 = vadd.xlane.f32.xlu1 %v1781_v55  ;;  %v1083_v55 = vmax.f32 %v1035_v33, %v4172_v35 }
 0x402   : > { %1791 = vadd.xlane.f32.xlu1 %v1790_v61  ;;  %v4173_v61 = vld [vmem:[#allocation22_spill] sm:$0xff] }
 0x40a   : > { %1800 = vadd.xlane.f32.xlu1 %v1799_v50  ;;  %v4174_v50 = vld [vmem:[#allocation16_spill] sm:$0xff] }
 0x40b   : > { %v944_v10 = vmax.f32 %v4174_v50, %v4173_v61 }
 0x46d   : > { %v1783_v32 = vpop.xlane.xlu1 %1782 }
 0x46e   : > { %v2173_v8 = vperm.slane %v1783_v32, %v3747_v40  ;;  %v1107_v32 = vrot.slane %v1083_v55, 1 }
 0x470   : > { %2175 = vst.msk [vmem:[%s3796_s8 + $0x1] sm:$0x1] %vm2170_vm13, %v2173_v8  ;;  %v4176_v8 = vld [vmem:[#allocation32_spill] sm:$0xff] }
 0x475   : > { %v1792_v45 = vpop.xlane.xlu1 %1791 }
 0x476   : > { %v1819_v11 = vperm.slane %v1792_v45, %v3747_v40 }
 0x478   : > { %v1821_v21 = vsel %vm1711_vm8, %v1820_v9, %v1819_v11  ;;  %v4177_v11 = vld [vmem:[#allocation38_spill] sm:$0xff] }
 0x479   : > { %v1828_v19 = vsel %vm1722_vm9, %v1821_v21, %v1818_v57  ;;  %v1856_v57 = vpop.permute.xlu0 %1855 }
 0x47a   : > { %v1873_v4 = vmul.f32 %v1856_v57, %v3011_v17  ;;  %v4182_v57 = vld [vmem:[#allocation39_spill] sm:$0xff] }
 0x47b   : > { %v4191_v18 = vrot.slane %v4182_v57, 4 }
 0x47d   : > { %v1801_v48 = vpop.xlane.xlu1 %1800 }
 0x47e   : > { %v1823_v28 = vperm.slane %v1801_v48, %v3750_v1 }
 0x480   : > { %v1824_v31 = vsel %vm1711_vm8, %v1823_v28, %v1822_v39  ;;  %v4180_v28 = vld [vmem:[#allocation11_spill] sm:$0xff] }
 0x481   : > { %v1829_v16 = vsel %vm1724_vm10, %v1824_v31, %v1828_v19  ;;  %v4178_v19 = vld [vmem:[#allocation36_spill] sm:$0xff] }
 0x482   : > { %v1830_v2 = vsel %vm1726_vm11, %v1827_v42, %v1829_v16  ;;  %v992_v42 = vmax.f32 %v944_v10, %v4175_v15  ;;  %v4179_v48 = vrot.slane %v4178_v19, 1 }
 0x483   : > { %v1832_v23 = vsel %vm1729_vm12, %v1830_v2, 0.0  ;;  %v4181_v2 = vrot.slane %v4178_v19, 2 }
 0x484   : > { %1833 = vadd.xlane.f32.xlu1 %v1832_v23  ;;  %v1040_v9 = vmax.f32 %v992_v42, %v4176_v8  ;;  %v1109_v39 = vsel %vm457_vm3, %v1107_v32, %v4179_v48 }
 0x485   : > { %v1135_v31 = vmax.f32 %v1083_v55, %v1109_v39  ;;  %v4193_v39 = vld [vmem:[#allocation24_spill] sm:$0xff] }
 0x486   : > { %v1088_v21 = vmax.f32 %v1040_v9, %v4177_v11 }
 0x488   : > { %v1115_v16 = vrot.slane %v1088_v21, 1 }
 0x49d   : > { %1847 = vrot.lane.b32.xlu1 %v3724_v62, %s2530_s20  ;;  %v1886_v62 = vpop.permute.xlu0 %1885 }
 0x4a5   : > { %1853 = vrot.lane.b32.xlu1 %v3737_v63, %s2530_s20  ;;  %v1910_v63 = vsel %vm1673_vm7, %v1886_v62, 0.0  ;;  %v1892_v52 = vpop.permute.xlu0 %1891 }
 0x4a6   : > { %v1919_v13 = vsel %vm1673_vm7, %v1892_v52, 0.0 }
 0x4ad   : > { %1883 = vrot.lane.b32.xlu1 %v1867_v53, %s2532_s29  ;;  %v1898_v20 = vpop.permute.xlu0 %1897  ;;  %v1180_v53 = vrot.slane %v1083_v55, 3 }
 0x4ae   : > { %v1928_v34 = vsel %vm1673_vm7, %v1898_v20, 0.0 }
 0x4b5   : > { %1889 = vrot.lane.b32.xlu1 %v1870_v26, %s2532_s29  ;;  %v1963_v33 = vpop.permute.xlu0 %1962 }
 0x4b6   : > { %v1988_v35 = vsel %vm1673_vm7, %v1963_v33, 0.0 }
 0x4bd   : > { %1895 = vrot.lane.b32.xlu1 %v1873_v4, %s2532_s29  ;;  %v4183_v4 = vrot.slane %v4182_v57, 1 }
 0x4bf   : > { %v1116_v62 = vsel %vm457_vm3, %v4183_v4, %v1115_v16  ;;  %v4196_v16 = vld [vmem:[#allocation18_spill] sm:$0xff] }
 0x4c5   : > { %1960 = vrot.lane.b32.xlu1 %v2949_v49, %s2532_s29 }
 0x4cd   : > { %1968 = vrot.lane.b32.xlu1 %v2992_v59, %s2532_s29 }
 0x4f7   : > { %v1834_v60 = vpop.xlane.xlu1 %1833  ;;  %1911 = vadd.xlane.f32.xlu1 %v1910_v63  ;;  %v4184_v63 = vld [vmem:[#allocation12_spill] sm:$0xff] }
 0x4f8   : > { %v2177_v0 = vperm.slane %v1834_v60, %v3747_v40  ;;  %v1151_v60 = vrot.slane %v1088_v21, 2 }
 0x4fa   : > { %2179 = vst.msk [vmem:[%s3796_s8 + $0x2] sm:$0x1] %vm2170_vm13, %v2177_v0  ;;  %v4185_v0 = vrot.slane %v4178_v19, 3 }
 0x4fc   : > { %v1182_v52 = vsel %vm1179_vm5, %v1180_v53, %v4185_v0  ;;  %v4200_v0 = vld [vmem:[#allocation30_spill] sm:$0xff] }
 0x4ff   : > { %1920 = vadd.xlane.f32.xlu1 %v1919_v13  ;;  %v1217_v13 = vrot.slane %v1083_v55, 4 }
 0x507   : > { %1929 = vadd.xlane.f32.xlu1 %v1928_v34  ;;  %v1138_v34 = vmax.f32 %v4182_v57, %v1116_v62 }
 0x50f   : > { %v1848_v49 = vpop.permute.xlu1 %1847 }
 0x510   : > { %v1869_v7 = vmul.f32 %v1848_v49, %v2974_v22  ;;  %v4167_v22 = vld [vmem:[#allocation14_spill] sm:$0xff]  ;;  %v1188_v49 = vrot.slane %v1088_v21, 3 }
 0x512   : > { %1887 = vrot.lane.b32.xlu2 %v1869_v7, %s2532_s29  ;;  %v4186_v7 = vrot.slane %v4178_v19, 4  ;;  %v3940_v19 = vpop.permute.xlu0 %1966 }
 0x517   : > { %v1854_v30 = vpop.permute.xlu1 %1853 }
 0x518   : > { %v1872_v37 = vmul.f32 %v1854_v30, %v2992_v59  ;;  %v4187_v30 = vrot.slane %v4182_v57, 2 }
 0x51a   : > { %1893 = vrot.lane.b32.xlu2 %v1872_v37, %s2532_s29  ;;  %v1152_v37 = vsel %vm494_vm4, %v4187_v30, %v1151_v60 }
 0x51f   : > { %v1884_v41 = vpop.permute.xlu1 %1883 }
 0x520   : > { %2033 = vrot.lane.b32.xlu1 %v3072_v6, %s2532_s29  ;;  %v1907_v29 = vsel %vm1673_vm7, %v1884_v41, 0.0  ;;  %v1174_v41 = vmax.f32 %v1138_v34, %v1152_v37  ;;  %v4203_v37 = vld [vmem:[#allocation40_spill] sm:$0xff] }
 0x522   : > { %1958 = vrot.lane.b32.xlu2 %v2952_v44, %s2532_s29 }
 0x527   : > { %v1890_v58 = vpop.permute.xlu1 %1889 }
 0x528   : > { %2039 = vrot.lane.b32.xlu1 %v3088_v25, %s2532_s29  ;;  %v1916_v44 = vsel %vm1673_vm7, %v1890_v58, 0.0  ;;  %v4188_v58 = vld [vmem:[#allocation9_spill] sm:$0xff] }
 0x52a   : > { %1964 = vrot.lane.b32.xlu2 %v2971_v54, %s2532_s29 }
 0x52f   : > { %v1896_v59 = vpop.permute.xlu1 %1895 }
 0x530   : > { %2045 = vrot.lane.b32.xlu1 %v4167_v22, %s2532_s29  ;;  %v1925_v25 = vsel %vm1673_vm7, %v1896_v59, 0.0 }
 0x537   : > { %v1961_v56 = vpop.permute.xlu1 %1960 }
 0x538   : > { %v1985_v6 = vsel %vm1673_vm7, %v1961_v56, 0.0  ;;  %v4189_v56 = vld [vmem:[#allocation13_spill] sm:$0xff] }
 0x53f   : > { %v3870_v5 = vpop.permute.xlu1 %1968 }
 0x553   : > { %1908 = vadd.xlane.f32.xlu2 %v1907_v29 }
 0x55a   : > { %1986 = vadd.xlane.f32.xlu1 %v1985_v6  ;;  %v4190_v6 = vrot.slane %v4182_v57, 3  ;;  %v4198_v57 = vld [vmem:[#allocation25_spill] sm:$0xff] }
 0x55b   : > { %1917 = vadd.xlane.f32.xlu2 %v1916_v44 }
 0x55c   : > { %v1189_v44 = vsel %vm1179_vm5, %v4190_v6, %v1188_v49 }
 0x563   : > { %1926 = vadd.xlane.f32.xlu2 %v1925_v25  ;;  %v1225_v25 = vrot.slane %v1088_v21, 4 }
 0x565   : > { %v1226_v46 = vsel %vm1216_vm6, %v4191_v18, %v1225_v25 }
 0x56a   : > { %v1912_v14 = vpop.xlane.xlu1 %1911 }
 0x56b   : > { %v1940_v10 = vperm.slane %v1912_v14, %v3750_v1 }
 0x56c   : > { %v1888_v54 = vpop.permute.xlu2 %1887 }
 0x56d   : > { %v1913_v51 = vsel %vm1673_vm7, %v1888_v54, 0.0 }
 0x56e   : > { %1914 = vadd.xlane.f32.xlu0 %v1913_v51  ;;  %v1211_v51 = vmax.f32 %v1174_v41, %v1189_v44 }
 0x570   : > { %v1248_v38 = vmax.f32 %v1211_v51, %v1226_v46 }
 0x572   : > { %v3884_v45 = vpop.xlane.xlu1 %1920 }
 0x573   : > { %v1945_v6 = vperm.slane %v3884_v45, %v3747_v40 }
 0x574   : > { %v1894_v36 = vpop.permute.xlu2 %1893 }
 0x575   : > { %v1922_v27 = vsel %vm1673_vm7, %v1894_v36, 0.0  ;;  %v4192_v36 = vld [vmem:[#allocation10_spill] sm:$0xff] }
 0x576   : > { %1923 = vadd.xlane.f32.xlu0 %v1922_v27 }
 0x57a   : > { %v1930_v26 = vpop.xlane.xlu1 %1929 }
 0x57b   : > { %1970 = vrot.lane.b32.xlu2 %v3011_v17, %s2532_s29  ;;  %v1143_v17 = vrot.slane %v1083_v55, 2  ;;  %v1949_v11 = vperm.slane %v1930_v26, %v3750_v1  ;;  %v4199_v26 = vld [vmem:[#allocation34_spill] sm:$0xff] }
 0x57c   : > { %v1959_v47 = vpop.permute.xlu2 %1958 }
 0x57d   : > { %v1145_v23 = vsel %vm494_vm4, %v1143_v17, %v4181_v2  ;;  %v1982_v61 = vsel %vm1673_vm7, %v1959_v47, 0.0 }
 0x57e   : > { %v1171_v24 = vmax.f32 %v1135_v31, %v1145_v23  ;;  %v4195_v31 = vld [vmem:[#allocation20_spill] sm:$0xff]  ;;  %v4197_v23 = vld [vmem:[#allocation29_spill] sm:$0xff] }
 0x57f   : > { %v946_v2 = vmax.f32 %v4196_v16, %v4195_v31  ;;  %v4208_v16 = vld [vmem:[#allocation41_spill] sm:$0xff] }
 0x580   : > { %v1208_v20 = vmax.f32 %v1171_v24, %v1182_v52 }
 0x581   : > { %v994_v4 = vmax.f32 %v946_v2, %v4198_v57 }
 0x583   : > { %2035 = vrot.lane.b32.xlu2 %v4180_v28, %s2532_s29  ;;  %v4194_v28 = vld [vmem:[#allocation19_spill] sm:$0xff]  ;;  %v1042_v52 = vmax.f32 %v994_v4, %v4200_v0 }
 0x584   : > { %v1965_v55 = vpop.permute.xlu2 %1964  ;;  %v945_v14 = vmax.f32 %v4194_v28, %v4193_v39  ;;  %v4207_v28 = vld [vmem:[#allocation33_spill] sm:$0xff] }
 0x585   : > { %v1991_v32 = vsel %vm1673_vm7, %v1965_v55, 0.0 }
 0x586   : > { %v993_v53 = vmax.f32 %v945_v14, %v4197_v23  ;;  %v4209_v23 = vld [vmem:[#allocation43_spill] sm:$0xff] }
 0x588   : > { %v1041_v62 = vmax.f32 %v993_v53, %v4199_v26 }
 0x58a   : > { %1972 = vrot.lane.b32.xlu0 %v3008_v43, %s2532_s29  ;;  %v1219_v43 = vsel %vm1216_vm6, %v1217_v13, %v4186_v7  ;;  %v4201_v13 = vld [vmem:[#allocation42_spill] sm:$0xff]  ;;  %v4202_v7 = vld [vmem:[#allocation35_spill] sm:$0xff] }
 0x58b   : > { %2041 = vrot.lane.b32.xlu2 %v4184_v63, %s2532_s29  ;;  %v1245_v22 = vmax.f32 %v1208_v20, %v1219_v43  ;;  %v1089_v20 = vmax.f32 %v1041_v62, %v4201_v13  ;;  %v3959_v43 = vmax.f32 %v1042_v52, %v4202_v7  ;;  %v4210_v7 = vld [vmem:[#allocation44_spill] sm:$0xff] }
 0x58d   : > { %v1117_v41 = vrot.slane %v1089_v20, 1  ;;  %v1153_v18 = vrot.slane %v1089_v20, 2  ;;  %v1191_v33 = vrot.slane %v3959_v43, 3  ;;  %v1227_v55 = vrot.slane %v1089_v20, 4 }
 0x592   : > { %2037 = vrot.lane.b32.xlu0 %v4188_v58, %s2532_s29  ;;  %v3914_v59 = vpop.permute.xlu1 %2033 }
 0x593   : > { %v2057_v29 = vmul.f32 %v3914_v59, %v1245_v22  ;;  %2047 = vrot.lane.b32.xlu2 %v4189_v56, %s2532_s29  ;;  %v1118_v56 = vrot.slane %v3959_v43, 1 }
 0x595   : > { %v2065_v54 = vsel %vm1673_vm7, %v2057_v29, 0.0 }
 0x596   : > { %2066 = vadd.xlane.f32.xlu1 %v2065_v54  ;;  %v1119_v54 = vsel %vm457_vm3, %v1117_v41, %v1118_v56 }
 0x59a   : > { %2043 = vrot.lane.b32.xlu0 %v4192_v36, %s2532_s29  ;;  %v3928_v27 = vpop.permute.xlu1 %2039  ;;  %v1154_v36 = vrot.slane %v3959_v43, 2 }
 0x59b   : > { %v2060_v3 = vmul.f32 %v3928_v27, %v1248_v38  ;;  %v1139_v38 = vmax.f32 %v1089_v20, %v1119_v54 }
 0x59c   : > { %v1155_v45 = vsel %vm494_vm4, %v1153_v18, %v1154_v36 }
 0x59d   : > { %v2074_v12 = vsel %vm1673_vm7, %v2060_v3, 0.0  ;;  %v2116_v3 = vsel %vm1673_vm7, %v3914_v59, 0.0  ;;  %v1175_v47 = vmax.f32 %v1139_v38, %v1155_v45 }
 0x59e   : > { %2075 = vadd.xlane.f32.xlu1 %v2074_v12  ;;  %v1190_v12 = vrot.slane %v1089_v20, 3 }
 0x5a2   : > { %v2046_v13 = vpop.permute.xlu1 %2045 }
 0x5a3   : > { %v2134_v38 = vsel %vm1673_vm7, %v2046_v13, 0.0 }
 0x5bc   : > { %1989 = vadd.xlane.f32.xlu2 %v1988_v35  ;;  %v1192_v35 = vsel %vm1179_vm5, %v1190_v12, %v1191_v33 }
 0x5c4   : > { %1983 = vadd.xlane.f32.xlu0 %v1982_v61  ;;  %v1212_v61 = vmax.f32 %v1175_v47, %v1192_v35 }
 0x5c6   : > { %v1909_v50 = vpop.xlane.xlu2 %1908 }
 0x5c7   : > { %v1939_v15 = vperm.slane %v1909_v50, %v3747_v40  ;;  %v1228_v50 = vrot.slane %v3959_v43, 4 }
 0x5c9   : > { %v1941_v42 = vsel %vm1711_vm8, %v1940_v10, %v1939_v15  ;;  %v2125_v10 = vsel %vm1673_vm7, %v3928_v27, 0.0  ;;  %v1229_v15 = vsel %vm1216_vm6, %v1227_v55, %v1228_v50 }
 0x5ca   : > { %v1249_v59 = vmax.f32 %v1212_v61, %v1229_v15 }
 0x5cc   : > { %1992 = vadd.xlane.f32.xlu0 %v1991_v32  ;;  %v4204_v32 = vld [vmem:[#allocation23_spill] sm:$0xff] }
 0x5cd   : > { %v1987_v35 = vpop.xlane.xlu1 %1986 }
 0x5ce   : > { %v1918_v8 = vpop.xlane.xlu2 %1917 }
 0x5cf   : > { %v1943_v63 = vperm.slane %v1918_v8, %v3750_v1  ;;  %v4205_v8 = vld [vmem:[#allocation17_spill] sm:$0xff] }
 0x5d6   : > { %v1927_v9 = vpop.xlane.xlu2 %1926 }
 0x5d7   : > { %v1948_v21 = vperm.slane %v1927_v9, %v3747_v40  ;;  %v947_v9 = vmax.f32 %v4205_v8, %v4204_v32 }
 0x5d9   : > { %v1950_v48 = vsel %vm1711_vm8, %v1949_v11, %v1948_v21 }
 0x5de   : > { %v3945_v17 = vpop.permute.xlu2 %1970 }
 0x5e1   : > { %v1915_v24 = vpop.xlane.xlu0 %1914 }
 0x5e2   : > { %v1942_v60 = vperm.slane %v1915_v24, %v3747_v40 }
 0x5e4   : > { %v1944_v34 = vsel %vm1711_vm8, %v1943_v63, %v1942_v60  ;;  %v1997_v60 = vsel %vm1673_vm7, %v3870_v5, 0.0 }
 0x5e5   : > { %v1951_v49 = vsel %vm1722_vm9, %v1944_v34, %v1941_v42 }
 0x5e6   : > { %v2036_v30 = vpop.permute.xlu2 %2035 }
 0x5e7   : > { %v2058_v22 = vmul.f32 %v2036_v30, %v4203_v37  ;;  %v2119_v20 = vsel %vm1673_vm7, %v2036_v30, 0.0  ;;  %v2063_v37 = vmul.f32 %v2046_v13, %v4210_v7  ;;  %v1994_v30 = vsel %vm1673_vm7, %v3940_v19, 0.0 }
 0x5e8   : > { %v2000_v19 = vsel %vm1673_vm7, %v3945_v17, 0.0 }
 0x5e9   : > { %v1924_v58 = vpop.xlane.xlu0 %1923  ;;  %v2068_v29 = vsel %vm1673_vm7, %v2058_v22, 0.0 }
 0x5ea   : > { %v1946_v44 = vperm.slane %v1924_v58, %v3750_v1  ;;  %2069 = vadd.xlane.f32.xlu2 %v2068_v29  ;;  %v2083_v29 = vsel %vm1673_vm7, %v2063_v37, 0.0 }
 0x5ec   : > { %v1947_v25 = vsel %vm1711_vm8, %v1946_v44, %v1945_v6 }
 0x5ed   : > { %v1952_v51 = vsel %vm1724_vm10, %v1947_v25, %v1951_v49 }
 0x5ee   : > { %v3971_v46 = vsel %vm1726_vm11, %v1950_v48, %v1952_v51  ;;  %v2042_v42 = vpop.permute.xlu2 %2041  ;;  %v4206_v48 = vld [vmem:[#allocation28_spill] sm:$0xff] }
 0x5ef   : > { %v2061_v21 = vmul.f32 %v2042_v42, %v1249_v59  ;;  %v995_v39 = vmax.f32 %v947_v9, %v4206_v48  ;;  %v1955_v12 = vsel %vm1729_vm12, %v3971_v46, 0.0 }
 0x5f1   : > { %v1043_v14 = vmax.f32 %v995_v39, %v4207_v28  ;;  %v2077_v31 = vsel %vm1673_vm7, %v2061_v21, 0.0 }
 0x5f2   : > { %2117 = vadd.xlane.f32.xlu2 %v2116_v3 }
 0x5f3   : > { %v1091_v2 = vmax.f32 %v1043_v14, %v4208_v16 }
 0x5f5   : > { %v1120_v57 = vrot.slane %v1091_v2, 1  ;;  %v1156_v62 = vrot.slane %v1091_v2, 2  ;;  %v1193_v34 = vrot.slane %v1091_v2, 3  ;;  %v1230_v58 = vrot.slane %v1091_v2, 4 }
 0x5f6   : > { %v2048_v44 = vpop.permute.xlu2 %2047 }
 0x5f7   : > { %v1121_v26 = vsel %vm457_vm3, %v1118_v56, %v1120_v57  ;;  %v1157_v49 = vsel %vm494_vm4, %v1154_v36, %v1156_v62  ;;  %v1194_v41 = vsel %vm1179_vm5, %v1191_v33, %v1193_v34  ;;  %v1231_v56 = vsel %vm1216_vm6, %v1228_v50, %v1230_v58  ;;  %v4211_v36 = vld [vmem:[#allocation45_spill] sm:$0xff] }
 0x5f8   : > { %v1140_v0 = vmax.f32 %v3959_v43, %v1121_v26  ;;  %v2128_v43 = vsel %vm1673_vm7, %v2042_v42, 0.0  ;;  %v2137_v51 = vsel %vm1673_vm7, %v2048_v44, 0.0  ;;  %v2064_v3 = vmul.f32 %v2048_v44, %v4211_v36 }
 0x5fa   : > { %2126 = vadd.xlane.f32.xlu2 %v2125_v10  ;;  %v1176_v22 = vmax.f32 %v1140_v0, %v1157_v49  ;;  %v2086_v45 = vsel %vm1673_vm7, %v2064_v3, 0.0 }
 0x5fc   : > { %v1973_v11 = vpop.permute.xlu0 %1972  ;;  %v1213_v5 = vmax.f32 %v1176_v22, %v1194_v41 }
 0x5fd   : > { %v2003_v54 = vsel %vm1673_vm7, %v1973_v11, 0.0 }
 0x5fe   : > { %v1250_v6 = vmax.f32 %v1213_v5, %v1231_v56 }
 0x602   : > { %2078 = vadd.xlane.f32.xlu2 %v2077_v31 }
 0x604   : > { %v2038_v27 = vpop.permute.xlu0 %2037 }
 0x605   : > { %v2059_v53 = vmul.f32 %v2038_v27, %v4209_v23  ;;  %v2122_v24 = vsel %vm1673_vm7, %v2038_v27, 0.0 }
 0x606   : > { %2123 = vadd.xlane.f32.xlu1 %v2122_v24 }
 0x607   : > { %v2071_v4 = vsel %vm1673_vm7, %v2059_v53, 0.0 }
 0x608   : > { %2072 = vadd.xlane.f32.xlu0 %v2071_v4 }
 0x609   : > { %v4018_v55 = vpop.xlane.xlu1 %2066 }
 0x60c   : > { %v2044_v63 = vpop.permute.xlu0 %2043 }
 0x60d   : > { %v2131_v52 = vsel %vm1673_vm7, %v2044_v63, 0.0  ;;  %v2062_v25 = vmul.f32 %v2044_v63, %v1250_v6  ;;  %v2015_v63 = vperm.slane %v1987_v35, %v3750_v1 }
 0x60e   : > { %1998 = vadd.xlane.f32.xlu1 %v1997_v60  ;;  %2132 = vadd.xlane.f32.xlu2 %v2131_v52 }
 0x60f   : > { %v2080_v18 = vsel %vm1673_vm7, %v2062_v25, 0.0 }
 0x610   : > { %2120 = vadd.xlane.f32.xlu0 %v2119_v20 }
 0x611   : > { %v2076_v10 = vpop.xlane.xlu1 %2075 }
 0x616   : > { %2129 = vadd.xlane.f32.xlu1 %v2128_v43  ;;  %2084 = vadd.xlane.f32.xlu2 %v2083_v29 }
 0x618   : > { %1995 = vadd.xlane.f32.xlu0 %v1994_v30 }
 0x61e   : > { %2004 = vadd.xlane.f32.xlu1 %v2003_v54  ;;  %2138 = vadd.xlane.f32.xlu2 %v2137_v51 }
 0x620   : > { %2081 = vadd.xlane.f32.xlu0 %v2080_v18 }
 0x626   : > { %2135 = vadd.xlane.f32.xlu1 %v2134_v38  ;;  %v2101_v38 = vperm.slane %v2076_v10, %v3750_v1 }
 0x628   : > { %2001 = vadd.xlane.f32.xlu0 %v2000_v19 }
 0x62f   : > { %v1990_v47 = vpop.xlane.xlu2 %1989 }
 0x630   : > { %2087 = vadd.xlane.f32.xlu0 %v2086_v45  ;;  %v2017_v4 = vperm.slane %v1990_v47, %v3747_v40  ;;  %v2097_v45 = vperm.slane %v4018_v55, %v3747_v40 }
 0x637   : > { %v1984_v50 = vpop.xlane.xlu0 %1983 }
 0x638   : > { %1956 = vadd.xlane.f32.xlu0 %v1955_v12  ;;  %v2014_v23 = vperm.slane %v1984_v50, %v3747_v40 }
 0x63a   : > { %v2016_v7 = vsel %vm1711_vm8, %v2015_v63, %v2014_v23 }
 0x63f   : > { %v1993_v15 = vpop.xlane.xlu0 %1992 }
 0x640   : > { %v2018_v16 = vperm.slane %v1993_v15, %v3750_v1 }
 0x642   : > { %v2019_v13 = vsel %vm1711_vm8, %v2018_v16, %v2017_v4 }
 0x643   : > { %v2026_v56 = vsel %vm1722_vm9, %v2019_v13, %v2016_v7 }
 0x65d   : > { %v4016_v33 = vpop.xlane.xlu2 %2069 }
 0x65e   : > { %v2098_v19 = vperm.slane %v4016_v33, %v3750_v1 }
 0x665   : > { %v2118_v61 = vpop.xlane.xlu2 %2117 }
 0x666   : > { %v2148_v2 = vperm.slane %v2118_v61, %v3747_v40  ;;  %v2099_v61 = vsel %vm1711_vm8, %v2098_v19, %v2097_v45 }
 0x66d   : > { %v2127_v17 = vpop.xlane.xlu2 %2126 }
 0x66e   : > { %v2152_v26 = vperm.slane %v2127_v17, %v3750_v1 }
 0x675   : > { %v2079_v59 = vpop.xlane.xlu2 %2078 }
 0x676   : > { %v2103_v3 = vperm.slane %v2079_v59, %v3747_v40 }
 0x679   : > { %v2124_v42 = vpop.xlane.xlu1 %2123 }
 0x67a   : > { %v2151_v27 = vperm.slane %v2124_v42, %v3747_v40 }
 0x67b   : > { %v2073_v32 = vpop.xlane.xlu0 %2072 }
 0x67c   : > { %v2153_v20 = vsel %vm1711_vm8, %v2152_v26, %v2151_v27  ;;  %v2100_v6 = vperm.slane %v2073_v32, %v3747_v40 }
 0x67e   : > { %v2102_v12 = vsel %vm1711_vm8, %v2101_v38, %v2100_v6 }
 0x67f   : > { %v2109_v10 = vsel %vm1722_vm9, %v2102_v12, %v2099_v61 }
 0x681   : > { %v1999_v8 = vpop.xlane.xlu1 %1998  ;;  %v2133_v9 = vpop.xlane.xlu2 %2132 }
 0x682   : > { %v2155_v53 = vperm.slane %v2133_v9, %v3750_v1  ;;  %v2021_v60 = vperm.slane %v1999_v8, %v3750_v1 }
 0x683   : > { %v2121_v11 = vpop.xlane.xlu0 %2120 }
 0x684   : > { %v2149_v14 = vperm.slane %v2121_v11, %v3750_v1 }
 0x686   : > { %v2150_v62 = vsel %vm1711_vm8, %v2149_v14, %v2148_v2 }
 0x687   : > { %v2160_v41 = vsel %vm1722_vm9, %v2153_v20, %v2150_v62 }
 0x689   : > { %v2130_v21 = vpop.xlane.xlu1 %2129  ;;  %v2085_v48 = vpop.xlane.xlu2 %2084 }
 0x68a   : > { %v2154_v31 = vperm.slane %v2130_v21, %v3747_v40  ;;  %v2106_v50 = vperm.slane %v2085_v48, %v3747_v40 }
 0x68b   : > { %v1996_v46 = vpop.xlane.xlu0 %1995 }
 0x68c   : > { %v2020_v24 = vperm.slane %v1996_v46, %v3747_v40  ;;  %v2156_v0 = vsel %vm1711_vm8, %v2155_v53, %v2154_v31 }
 0x68d   : > { %v2161_v29 = vsel %vm1724_vm10, %v2156_v0, %v2160_v41 }
 0x68e   : > { %v2022_v37 = vsel %vm1711_vm8, %v2021_v60, %v2020_v24 }
 0x68f   : > { %v2027_v54 = vsel %vm1724_vm10, %v2022_v37, %v2026_v56 }
 0x691   : > { %v2005_v39 = vpop.xlane.xlu1 %2004  ;;  %v2139_v57 = vpop.xlane.xlu2 %2138 }
 0x692   : > { %v2158_v34 = vperm.slane %v2139_v57, %v3750_v1  ;;  %v2024_v58 = vperm.slane %v2005_v39, %v3750_v1 }
 0x693   : > { %v2082_v28 = vpop.xlane.xlu0 %2081 }
 0x694   : > { %v2104_v51 = vperm.slane %v2082_v28, %v3750_v1 }
 0x696   : > { %v2105_v47 = vsel %vm1711_vm8, %v2104_v51, %v2103_v3 }
 0x697   : > { %v2110_v55 = vsel %vm1724_vm10, %v2105_v47, %v2109_v10 }
 0x699   : > { %v2136_v52 = vpop.xlane.xlu1 %2135 }
 0x69a   : > { %v2157_v49 = vperm.slane %v2136_v52, %v3747_v40 }
 0x69b   : > { %v2002_v22 = vpop.xlane.xlu0 %2001 }
 0x69c   : > { %v2023_v5 = vperm.slane %v2002_v22, %v3747_v40  ;;  %v2159_v43 = vsel %vm1711_vm8, %v2158_v34, %v2157_v49 }
 0x69d   : > { %v2162_v30 = vsel %vm1726_vm11, %v2159_v43, %v2161_v29 }
 0x69e   : > { %v2164_v44 = vsel %vm1729_vm12, %v2162_v30, 0.0  ;;  %v2025_v25 = vsel %vm1711_vm8, %v2024_v58, %v2023_v5 }
 0x69f   : > { %2165 = vadd.xlane.f32.xlu2 %v2164_v44  ;;  %v2028_v18 = vsel %vm1726_vm11, %v2025_v25, %v2027_v54 }
 0x6a0   : > { %v2030_v36 = vsel %vm1729_vm12, %v2028_v18, 0.0 }
 0x6a1   : > { %2031 = vadd.xlane.f32.xlu0 %v2030_v36 }
 0x6a3   : > { %v2088_v35 = vpop.xlane.xlu0 %2087 }
 0x6a4   : > { %v2107_v33 = vperm.slane %v2088_v35, %v3750_v1 }
 0x6a6   : > { %v2108_v17 = vsel %vm1711_vm8, %v2107_v33, %v2106_v50 }
 0x6a7   : > { %v2111_v15 = vsel %vm1726_vm11, %v2108_v17, %v2110_v55 }
 0x6a8   : > { %v2113_v42 = vsel %vm1729_vm12, %v2111_v15, 0.0 }
 0x6a9   : > { %2114 = vadd.xlane.f32.xlu1 %v2113_v42 }
 0x6ab   : > { %v1957_v59 = vpop.xlane.xlu0 %1956 }
 0x6ac   : > { %v2181_v32 = vperm.slane %v1957_v59, %v3747_v40 }
 0x6ae   : > { %2183 = vst.msk [vmem:[%s3796_s8 + $0x3] sm:$0x1] %vm2170_vm13, %v2181_v32 }
 0x712   : > { %v2166_v8 = vpop.xlane.xlu2 %2165 }
 0x713   : > { %v2193_v1 = vperm.slane %v2166_v8, %v3747_v40 }
 0x714   : > { %v2032_v9 = vpop.xlane.xlu0 %2031 }
 0x715   : > { %2195 = vst.msk [vmem:[%s3796_s8 + $0x6] sm:$0x1] %vm2170_vm13, %v2193_v1  ;;  %v2185_v11 = vperm.slane %v2032_v9, %v3747_v40 }
 0x717   : > { %2187 = vst.msk [vmem:[%s3796_s8 + $0x4] sm:$0x1] %vm2170_vm13, %v2185_v11 }
 0x71c   : > { %v2115_v21 = vpop.xlane.xlu1 %2114 }
 0x71d   : > { %v2189_v46 = vperm.slane %v2115_v21, %v3747_v40 }
 0x71f   : > { %2191 = vst.msk [vmem:[%s3796_s8 + $0x5] sm:$0x1] %vm2170_vm13, %v2189_v46 }
 0x720 PF: > { %s18_s14 = sadd.s32 1, %s2525_s14   ;;  %s4212_s9 = smov %s2509_s10 }
 0x721   : > { %p15_p0 = scmp.ge.s32.totalorder %s18_s14, 4   ;;  %s4213_s10 = smov %s2513_s11 }
 0x722   : > { %s4214_s11 = smov %s2600_s21  ;;  %s4215_s12 = smov %s2521_s13 }
 0x723   : > { %s4216_s13 = smov %s4218_s16  ;;  %17 = sbr.rel (!%p15_p0) target bundleno = 6 (0x6), region = 81 }
 0x728   :  { %2221 = vsyncpa [#allocation4], 1 }
 0x729   :  { %2223 = vsyncpa [#allocation4 + $0x1], 1 }
 0x72a   :  { %2224 = vsyncpa [#allocation6], 1 }
 0x72b   :  { %2226 = vsyncpa [#allocation6 + $0x1], 1 }

</bundles_post_ra>
